<compile_context>
chip_gen: v7x
topology: tpu7x:2x2x1
jax: 0.10.0
libtpu: 0.0.40
codegen_flags: <defaults>
</compile_context>

<pallas_src>
import functools
import math

import jax
import jax.numpy as jnp
from jax.experimental import pallas as pl
from jax.experimental.pallas import tpu as pltpu


def _mha_proj_kernel(x_ref, wl_ref, bl_ref, wqkv_ref, bqkv_ref, wo_ref, bo_ref,
                     out_ref, attn_ref, *, num_heads, head_dim, block_b,
                     seq_len, embed_dim):
    """One batch-block per grid step: linear proj + multihead self-attention."""
    bt, n, hd, E = block_b, seq_len, head_dim, embed_dim
    m_rows = bt * n
    scale = 1.0 / math.sqrt(hd)
    cdt = wl_ref.dtype                       # MXU compute dtype (f32 or bf16)

    # ---- Linear(in_dim -> embed_dim); all bt*n rows batched into M ---------
    x2d = x_ref[...].reshape(m_rows, x_ref.shape[-1])
    proj = jnp.dot(x2d, wl_ref[...], preferred_element_type=jnp.float32) + bl_ref[...]
    proj = proj.astype(cdt)

    out_acc = jnp.zeros((m_rows, E), jnp.float32)
    attn_acc = jnp.zeros((bt, n, n), jnp.float32)

    # num_heads is small & static -> unrolled loop. Per-head weight slabs
    # (prepared in the wrapper) mean no lane slicing and no concat in-kernel.
    # TODO(synk): for large n, move out_acc/attn_acc into VMEM scratch to bound
    # vreg pressure across the unrolled head loop.
    for h in range(num_heads):
        q = jnp.dot(proj, wqkv_ref[0, h], preferred_element_type=jnp.float32) + bqkv_ref[0, h]
        k = jnp.dot(proj, wqkv_ref[1, h], preferred_element_type=jnp.float32) + bqkv_ref[1, h]
        v = jnp.dot(proj, wqkv_ref[2, h], preferred_element_type=jnp.float32) + bqkv_ref[2, h]

        q3 = (q * scale).astype(cdt).reshape(bt, n, hd)
        k3 = k.astype(cdt).reshape(bt, n, hd)
        v3 = v.astype(cdt).reshape(bt, n, hd)

        # Batched scores, contracting the head dim (no explicit transpose).
        s = jnp.einsum("bqd,bkd->bqk", q3, k3, preferred_element_type=jnp.float32)
        s_max = jnp.max(s, axis=-1, keepdims=True)
        e = jnp.exp(s - s_max)
        denom = jnp.sum(e, axis=-1, keepdims=True)
        p = e * pl.reciprocal(denom, approx=True)          # softmax (f32, EUP)
        attn_acc = attn_acc + p

        ctx = jnp.einsum("bqk,bkd->bqd", p.astype(cdt), v3,
                         preferred_element_type=jnp.float32)
        # summing per-head slabs == concat(heads) @ Wo^T
        out_acc = out_acc + jnp.dot(ctx.reshape(m_rows, hd).astype(cdt),
                                    wo_ref[h], preferred_element_type=jnp.float32)

    out = out_acc + bo_ref[...]
    out_ref[...] = out.reshape(bt, n, E).astype(out_ref.dtype)
    # head-averaged attention weights, kept in float32 (matches PyTorch).
    attn_ref[...] = (attn_acc * (1.0 / num_heads)).astype(attn_ref.dtype)


def multihead_attention_projection(x, params, num_heads, *, block_b=8,
                                   matmul_dtype=None):
    """Wrapper matching the PyTorch module semantics (2-D or 3-D input)."""
    squeeze = (x.ndim == 2)
    if squeeze:
        x = x[None]
    B, n, in_dim = x.shape
    E = params["w_linear"].shape[0]
    H = num_heads
    hd = E // H
    out_dtype = x.dtype
    cdt = jnp.dtype(matmul_dtype) if matmul_dtype is not None else x.dtype

    # ---- weight preparation (plain JAX glue) --------------------------------
    wl_t = params["w_linear"].T.astype(cdt)                        # (in_dim, E)
    bl = params["b_linear"].reshape(1, E).astype(jnp.float32)
    # packed in_proj (3E, E) -> per-head slabs (3, H, E, hd)
    w_qkv = params["w_in_proj"].reshape(3, H, hd, E).transpose(0, 1, 3, 2).astype(cdt)
    b_qkv = params["b_in_proj"].reshape(3, H, 1, hd).astype(jnp.float32)
    # out_proj (E, E): Wo^T row-chunked per head -> (H, hd, E)
    wo_h = params["w_out_proj"].T.reshape(H, hd, E).astype(cdt)
    bo = params["b_out_proj"].reshape(1, E).astype(jnp.float32)

    # ---- batch blocking: several batch elements per grid step ---------------
    bt = max(1, min(B, block_b))
    n_blocks = -(-B // bt)
    B_pad = n_blocks * bt
    if B_pad != B:
        x = jnp.pad(x, ((0, B_pad - B), (0, 0), (0, 0)))
    x = x.astype(cdt)

    kernel = functools.partial(_mha_proj_kernel, num_heads=H, head_dim=hd,
                               block_b=bt, seq_len=n, embed_dim=E)

    out, attn = pl.pallas_call(
        kernel,
        out_shape=(jax.ShapeDtypeStruct((B_pad, n, E), out_dtype),
                   jax.ShapeDtypeStruct((B_pad, n, n), jnp.float32)),
        grid_spec=pltpu.PrefetchScalarGridSpec(
            num_scalar_prefetch=0,
            grid=(n_blocks,),
            in_specs=[
                pl.BlockSpec((bt, n, in_dim), lambda b: (b, 0, 0)),
                pl.BlockSpec((in_dim, E), lambda b: (0, 0)),
                pl.BlockSpec((1, E), lambda b: (0, 0)),
                pl.BlockSpec((3, H, E, hd), lambda b: (0, 0, 0, 0)),
                pl.BlockSpec((3, H, 1, hd), lambda b: (0, 0, 0, 0)),
                pl.BlockSpec((H, hd, E), lambda b: (0, 0, 0)),
                pl.BlockSpec((1, E), lambda b: (0, 0)),
            ],
            out_specs=[
                pl.BlockSpec((bt, n, E), lambda b: (b, 0, 0)),
                pl.BlockSpec((bt, n, n), lambda b: (b, 0, 0)),
            ],
        ),
        compiler_params=pltpu.CompilerParams(
            dimension_semantics=("parallel",)),   # shards batch blocks on v7x
    )(x, wl_t, bl, w_qkv, b_qkv, wo_h, bo)

    out = out[:B]
    attn = attn[:B]
    if squeeze:
        out = out[0]
        attn = attn[0]        # PyTorch returns (L, S) attention for 2-D input
    return out, attn


def init_params(key, in_dim, embed_dim):
    """Deterministic synthetic parameters (shapes match the nn.Module)."""
    k1, k2, k3, k4, k5 = jax.random.split(key, 5)

    def uniform(k, shape, fan_in):
        bound = 1.0 / (fan_in ** 0.5)
        return jax.random.uniform(k, shape, jnp.float32, -bound, bound)

    return {
        # nn.Linear(in_dim, embed_dim)
        "w_linear": uniform(k1, (embed_dim, in_dim), in_dim),
        "b_linear": uniform(k2, (embed_dim,), in_dim),
        # nn.MultiheadAttention packed in-projection + out-projection
        "w_in_proj": jax.random.normal(k3, (3 * embed_dim, embed_dim), jnp.float32) * 0.05,
        "b_in_proj": uniform(k4, (3 * embed_dim,), embed_dim),
        "w_out_proj": uniform(k5, (embed_dim, embed_dim), embed_dim),
        "b_out_proj": jnp.zeros((embed_dim,), jnp.float32),
    }


def _reference(x, params, num_heads):
    """Pure-JAX reference (same math as torch F.multi_head_attention_forward)."""
    squeeze = (x.ndim == 2)
    if squeeze:
        x = x[None]
    E = params["w_linear"].shape[0]
    H = num_heads
    hd = E // H
    B, n, _ = x.shape
    proj = x @ params["w_linear"].T + params["b_linear"]
    qkv = proj @ params["w_in_proj"].T + params["b_in_proj"]
    q, k, v = qkv[..., :E], qkv[..., E:2 * E], qkv[..., 2 * E:]

    def split(t):
        return t.reshape(B, n, H, hd).transpose(0, 2, 1, 3)

    qh, kh, vh = split(q), split(k), split(v)
    s = jnp.einsum("bhqd,bhkd->bhqk", qh, kh) / math.sqrt(hd)
    p = jax.nn.softmax(s, axis=-1)
    ctx = jnp.einsum("bhqk,bhkd->bhqd", p, vh)
    ctx = ctx.transpose(0, 2, 1, 3).reshape(B, n, E)
    out = ctx @ params["w_out_proj"].T + params["b_out_proj"]
    attn = p.mean(axis=1)
    if squeeze:
        out, attn = out[0], attn[0]
    return out, attn


if __name__ == "__main__":
    B, n, in_dim, embed_dim, num_heads = 2, 8, 16, 32, 4

    key = jax.random.PRNGKey(0)
    kx, kp = jax.random.split(key)
    x = jax.random.normal(kx, (B, n, in_dim), jnp.float32)
    params = init_params(kp, in_dim, embed_dim)

    out, attn = multihead_attention_projection(x, params, num_heads)
    jax.block_until_ready((out, attn))

    assert out.shape == (B, n, embed_dim), out.shape
    assert attn.shape == (B, n, n), attn.shape
    assert attn.dtype == jnp.float32, attn.dtype
    # attention rows should sum to ~1 (approx reciprocal in the normalizer)
    assert bool(jnp.all(jnp.abs(jnp.sum(attn, axis=-1) - 1.0) < 1e-2))

    with jax.default_matmul_precision("highest"):
        ref_out, ref_attn = _reference(x, params, num_heads)
    assert bool(jnp.allclose(out, ref_out, rtol=2e-2, atol=2e-2))
    assert bool(jnp.allclose(attn, ref_attn, rtol=2e-2, atol=2e-2))

    # unbatched (2-D) path: PyTorch returns (n, E) and (n, n)
    out2, attn2 = multihead_attention_projection(x[0], params, num_heads)
    jax.block_until_ready((out2, attn2))
    assert out2.shape == (n, embed_dim) and attn2.shape == (n, n)

    print("KERNEL_OK")
</pallas_src>

<mosaic_0001>
module attributes {stable_mosaic.version = 11 : i64} {
  func.func @_mha_proj_kernel(%arg0: i32, %arg1: memref<2x8x16xf32, #tpu.memory_space<vmem>>, %arg2: memref<16x32xf32, #tpu.memory_space<vmem>>, %arg3: memref<1x32xf32, #tpu.memory_space<vmem>>, %arg4: memref<3x4x32x8xf32, #tpu.memory_space<vmem>>, %arg5: memref<3x4x1x8xf32, #tpu.memory_space<vmem>>, %arg6: memref<4x8x32xf32, #tpu.memory_space<vmem>>, %arg7: memref<1x32xf32, #tpu.memory_space<vmem>>, %arg8: memref<2x8x32xf32, #tpu.memory_space<vmem>>, %arg9: memref<2x8x8xf32, #tpu.memory_space<vmem>>) attributes {dimension_semantics = [#tpu.dimension_semantics<parallel>], iteration_bounds = array<i64: 1>, scalar_prefetch = 0 : i64, scratch_operands = 0 : i64, tpu.core_type = #tpu.core_type<tc>, window_params = [{transform_indices = @transform_0, window_bounds = array<i64: 2, 8, 16>}, {pipeline_mode = #tpu.pipeline_mode<synchronous>, transform_indices = @transform_1, window_bounds = array<i64: 16, 32>}, {pipeline_mode = #tpu.pipeline_mode<synchronous>, transform_indices = @transform_2, window_bounds = array<i64: 1, 32>}, {pipeline_mode = #tpu.pipeline_mode<synchronous>, transform_indices = @transform_3, window_bounds = array<i64: 3, 4, 32, 8>}, {pipeline_mode = #tpu.pipeline_mode<synchronous>, transform_indices = @transform_4, window_bounds = array<i64: 3, 4, 1, 8>}, {pipeline_mode = #tpu.pipeline_mode<synchronous>, transform_indices = @transform_5, window_bounds = array<i64: 4, 8, 32>}, {pipeline_mode = #tpu.pipeline_mode<synchronous>, transform_indices = @transform_6, window_bounds = array<i64: 1, 32>}, {transform_indices = @transform_7, window_bounds = array<i64: 2, 8, 32>}, {transform_indices = @transform_8, window_bounds = array<i64: 2, 8, 8>}]} {
    %c0 = arith.constant 0 : index
    %c0_0 = arith.constant 0 : index
    %c0_1 = arith.constant 0 : index
    %0 = vector.load %arg1[%c0, %c0_0, %c0_1] : memref<2x8x16xf32, #tpu.memory_space<vmem>>, vector<2x8x16xf32>
    %1 = vector.shape_cast %0 : vector<2x8x16xf32> to vector<16x16xf32>
    %c0_2 = arith.constant 0 : index
    %c0_3 = arith.constant 0 : index
    %2 = vector.load %arg2[%c0_2, %c0_3] : memref<16x32xf32, #tpu.memory_space<vmem>>, vector<16x32xf32>
    %cst = arith.constant dense<0.000000e+00> : vector<16x32xf32>
    %3 = tpu.matmul %1, %2, %cst {dimension_numbers = #tpu.dot_dimension_numbers<[1], [0], [0], [1], [0, 0, 1, 1], [], []>} : vector<16x16xf32>, vector<16x32xf32>, vector<16x32xf32> -> vector<16x32xf32>
    %c0_4 = arith.constant 0 : index
    %c0_5 = arith.constant 0 : index
    %4 = vector.load %arg3[%c0_4, %c0_5] : memref<1x32xf32, #tpu.memory_space<vmem>>, vector<1x32xf32>
    %5 = vector.broadcast %4 : vector<1x32xf32> to vector<16x32xf32>
    %6 = arith.addf %3, %5 : vector<16x32xf32>
    %cst_6 = arith.constant 0.000000e+00 : f32
    %7 = vector.broadcast %cst_6 : f32 to vector<16x32xf32>
    %cst_7 = arith.constant 0.000000e+00 : f32
    %8 = vector.broadcast %cst_7 : f32 to vector<2x8x8xf32>
    %c0_8 = arith.constant 0 : index
    %c0_9 = arith.constant 0 : index
    %c0_10 = arith.constant 0 : index
    %c0_11 = arith.constant 0 : index
    %9 = vector.load %arg4[%c0_8, %c0_9, %c0_10, %c0_11] : memref<3x4x32x8xf32, #tpu.memory_space<vmem>>, vector<1x1x32x8xf32>
    %10 = vector.shape_cast %9 : vector<1x1x32x8xf32> to vector<32x8xf32>
    %cst_12 = arith.constant dense<0.000000e+00> : vector<16x8xf32>
    %11 = tpu.matmul %6, %10, %cst_12 {dimension_numbers = #tpu.dot_dimension_numbers<[1], [0], [0], [1], [0, 0, 1, 1], [], []>} : vector<16x32xf32>, vector<32x8xf32>, vector<16x8xf32> -> vector<16x8xf32>
    %c0_13 = arith.constant 0 : index
    %c0_14 = arith.constant 0 : index
    %c0_15 = arith.constant 0 : index
    %c0_16 = arith.constant 0 : index
    %12 = vector.load %arg5[%c0_13, %c0_14, %c0_15, %c0_16] : memref<3x4x1x8xf32, #tpu.memory_space<vmem>>, vector<1x1x1x8xf32>
    %13 = vector.shape_cast %12 : vector<1x1x1x8xf32> to vector<1x8xf32>
    %14 = vector.broadcast %13 : vector<1x8xf32> to vector<16x8xf32>
    %15 = arith.addf %11, %14 : vector<16x8xf32>
    %c1 = arith.constant 1 : index
    %c0_17 = arith.constant 0 : index
    %c0_18 = arith.constant 0 : index
    %c0_19 = arith.constant 0 : index
    %16 = vector.load %arg4[%c1, %c0_17, %c0_18, %c0_19] : memref<3x4x32x8xf32, #tpu.memory_space<vmem>>, vector<1x1x32x8xf32>
    %17 = vector.shape_cast %16 : vector<1x1x32x8xf32> to vector<32x8xf32>
    %cst_20 = arith.constant dense<0.000000e+00> : vector<16x8xf32>
    %18 = tpu.matmul %6, %17, %cst_20 {dimension_numbers = #tpu.dot_dimension_numbers<[1], [0], [0], [1], [0, 0, 1, 1], [], []>} : vector<16x32xf32>, vector<32x8xf32>, vector<16x8xf32> -> vector<16x8xf32>
    %c1_21 = arith.constant 1 : index
    %c0_22 = arith.constant 0 : index
    %c0_23 = arith.constant 0 : index
    %c0_24 = arith.constant 0 : index
    %19 = vector.load %arg5[%c1_21, %c0_22, %c0_23, %c0_24] : memref<3x4x1x8xf32, #tpu.memory_space<vmem>>, vector<1x1x1x8xf32>
    %20 = vector.shape_cast %19 : vector<1x1x1x8xf32> to vector<1x8xf32>
    %21 = vector.broadcast %20 : vector<1x8xf32> to vector<16x8xf32>
    %22 = arith.addf %18, %21 : vector<16x8xf32>
    %c2 = arith.constant 2 : index
    %c0_25 = arith.constant 0 : index
    %c0_26 = arith.constant 0 : index
    %c0_27 = arith.constant 0 : index
    %23 = vector.load %arg4[%c2, %c0_25, %c0_26, %c0_27] : memref<3x4x32x8xf32, #tpu.memory_space<vmem>>, vector<1x1x32x8xf32>
    %24 = vector.shape_cast %23 : vector<1x1x32x8xf32> to vector<32x8xf32>
    %cst_28 = arith.constant dense<0.000000e+00> : vector<16x8xf32>
    %25 = tpu.matmul %6, %24, %cst_28 {dimension_numbers = #tpu.dot_dimension_numbers<[1], [0], [0], [1], [0, 0, 1, 1], [], []>} : vector<16x32xf32>, vector<32x8xf32>, vector<16x8xf32> -> vector<16x8xf32>
    %c2_29 = arith.constant 2 : index
    %c0_30 = arith.constant 0 : index
    %c0_31 = arith.constant 0 : index
    %c0_32 = arith.constant 0 : index
    %26 = vector.load %arg5[%c2_29, %c0_30, %c0_31, %c0_32] : memref<3x4x1x8xf32, #tpu.memory_space<vmem>>, vector<1x1x1x8xf32>
    %27 = vector.shape_cast %26 : vector<1x1x1x8xf32> to vector<1x8xf32>
    %28 = vector.broadcast %27 : vector<1x8xf32> to vector<16x8xf32>
    %29 = arith.addf %25, %28 : vector<16x8xf32>
    %cst_33 = arith.constant 0.353553385 : f32
    %30 = vector.broadcast %cst_33 : f32 to vector<16x8xf32>
    %31 = arith.mulf %15, %30 : vector<16x8xf32>
    %32 = vector.shape_cast %31 : vector<16x8xf32> to vector<2x8x8xf32>
    %33 = vector.shape_cast %22 : vector<16x8xf32> to vector<2x8x8xf32>
    %34 = vector.shape_cast %29 : vector<16x8xf32> to vector<2x8x8xf32>
    "tpu.trace_start"() <{level = 10 : i32, message = "bqd,bkd->bqk"}> : () -> ()
    %cst_34 = arith.constant dense<0.000000e+00> : vector<2x8x8xf32>
    %35 = tpu.matmul %32, %33, %cst_34 {dimension_numbers = #tpu.dot_dimension_numbers<[2], [2], [1], [1], [0, 0, 0, 1, 1, 1], [0], [0]>} : vector<2x8x8xf32>, vector<2x8x8xf32>, vector<2x8x8xf32> -> vector<2x8x8xf32>
    "tpu.trace_stop"() : () -> ()
    %cst_35 = arith.constant dense<0xFF800000> : vector<2x8xf32>
    %36 = vector.multi_reduction <maximumf>, %35, %cst_35 [2] : vector<2x8x8xf32> to vector<2x8xf32>
    %37 = vector.shape_cast %36 : vector<2x8xf32> to vector<2x8x1xf32>
    %38 = vector.broadcast %37 : vector<2x8x1xf32> to vector<2x8x8xf32>
    %39 = arith.subf %35, %38 : vector<2x8x8xf32>
    %40 = math.exp %39 : vector<2x8x8xf32>
    %cst_36 = arith.constant dense<0.000000e+00> : vector<2x8xf32>
    %41 = vector.multi_reduction <add>, %40, %cst_36 [2] : vector<2x8x8xf32> to vector<2x8xf32>
    %42 = vector.shape_cast %41 : vector<2x8xf32> to vector<2x8x1xf32>
    %43 = tpu.reciprocal %42 {approx = true} : vector<2x8x1xf32> -> vector<2x8x1xf32>
    %44 = vector.broadcast %43 : vector<2x8x1xf32> to vector<2x8x8xf32>
    %45 = arith.mulf %40, %44 : vector<2x8x8xf32>
    %46 = arith.addf %8, %45 : vector<2x8x8xf32>
    "tpu.trace_start"() <{level = 10 : i32, message = "bqk,bkd->bqd"}> : () -> ()
    %cst_37 = arith.constant dense<0.000000e+00> : vector<2x8x8xf32>
    %47 = tpu.matmul %45, %34, %cst_37 {dimension_numbers = #tpu.dot_dimension_numbers<[2], [1], [1], [2], [0, 0, 0, 1, 1, 2], [0], [0]>} : vector<2x8x8xf32>, vector<2x8x8xf32>, vector<2x8x8xf32> -> vector<2x8x8xf32>
    "tpu.trace_stop"() : () -> ()
    %48 = vector.shape_cast %47 : vector<2x8x8xf32> to vector<16x8xf32>
    %c0_38 = arith.constant 0 : index
    %c0_39 = arith.constant 0 : index
    %c0_40 = arith.constant 0 : index
    %49 = vector.load %arg6[%c0_38, %c0_39, %c0_40] : memref<4x8x32xf32, #tpu.memory_space<vmem>>, vector<1x8x32xf32>
    %50 = vector.shape_cast %49 : vector<1x8x32xf32> to vector<8x32xf32>
    %cst_41 = arith.constant dense<0.000000e+00> : vector<16x32xf32>
    %51 = tpu.matmul %48, %50, %cst_41 {dimension_numbers = #tpu.dot_dimension_numbers<[1], [0], [0], [1], [0, 0, 1, 1], [], []>} : vector<16x8xf32>, vector<8x32xf32>, vector<16x32xf32> -> vector<16x32xf32>
    %52 = arith.addf %7, %51 : vector<16x32xf32>
    %c0_42 = arith.constant 0 : index
    %c1_43 = arith.constant 1 : index
    %c0_44 = arith.constant 0 : index
    %c0_45 = arith.constant 0 : index
    %53 = vector.load %arg4[%c0_42, %c1_43, %c0_44, %c0_45] : memref<3x4x32x8xf32, #tpu.memory_space<vmem>>, vector<1x1x32x8xf32>
    %54 = vector.shape_cast %53 : vector<1x1x32x8xf32> to vector<32x8xf32>
    %cst_46 = arith.constant dense<0.000000e+00> : vector<16x8xf32>
    %55 = tpu.matmul %6, %54, %cst_46 {dimension_numbers = #tpu.dot_dimension_numbers<[1], [0], [0], [1], [0, 0, 1, 1], [], []>} : vector<16x32xf32>, vector<32x8xf32>, vector<16x8xf32> -> vector<16x8xf32>
    %c0_47 = arith.constant 0 : index
    %c1_48 = arith.constant 1 : index
    %c0_49 = arith.constant 0 : index
    %c0_50 = arith.constant 0 : index
    %56 = vector.load %arg5[%c0_47, %c1_48, %c0_49, %c0_50] : memref<3x4x1x8xf32, #tpu.memory_space<vmem>>, vector<1x1x1x8xf32>
    %57 = vector.shape_cast %56 : vector<1x1x1x8xf32> to vector<1x8xf32>
    %58 = vector.broadcast %57 : vector<1x8xf32> to vector<16x8xf32>
    %59 = arith.addf %55, %58 : vector<16x8xf32>
    %c1_51 = arith.constant 1 : index
    %c1_52 = arith.constant 1 : index
    %c0_53 = arith.constant 0 : index
    %c0_54 = arith.constant 0 : index
    %60 = vector.load %arg4[%c1_51, %c1_52, %c0_53, %c0_54] : memref<3x4x32x8xf32, #tpu.memory_space<vmem>>, vector<1x1x32x8xf32>
    %61 = vector.shape_cast %60 : vector<1x1x32x8xf32> to vector<32x8xf32>
    %cst_55 = arith.constant dense<0.000000e+00> : vector<16x8xf32>
    %62 = tpu.matmul %6, %61, %cst_55 {dimension_numbers = #tpu.dot_dimension_numbers<[1], [0], [0], [1], [0, 0, 1, 1], [], []>} : vector<16x32xf32>, vector<32x8xf32>, vector<16x8xf32> -> vector<16x8xf32>
    %c1_56 = arith.constant 1 : index
    %c1_57 = arith.constant 1 : index
    %c0_58 = arith.constant 0 : index
    %c0_59 = arith.constant 0 : index
    %63 = vector.load %arg5[%c1_56, %c1_57, %c0_58, %c0_59] : memref<3x4x1x8xf32, #tpu.memory_space<vmem>>, vector<1x1x1x8xf32>
    %64 = vector.shape_cast %63 : vector<1x1x1x8xf32> to vector<1x8xf32>
    %65 = vector.broadcast %64 : vector<1x8xf32> to vector<16x8xf32>
    %66 = arith.addf %62, %65 : vector<16x8xf32>
    %c2_60 = arith.constant 2 : index
    %c1_61 = arith.constant 1 : index
    %c0_62 = arith.constant 0 : index
    %c0_63 = arith.constant 0 : index
    %67 = vector.load %arg4[%c2_60, %c1_61, %c0_62, %c0_63] : memref<3x4x32x8xf32, #tpu.memory_space<vmem>>, vector<1x1x32x8xf32>
    %68 = vector.shape_cast %67 : vector<1x1x32x8xf32> to vector<32x8xf32>
    %cst_64 = arith.constant dense<0.000000e+00> : vector<16x8xf32>
    %69 = tpu.matmul %6, %68, %cst_64 {dimension_numbers = #tpu.dot_dimension_numbers<[1], [0], [0], [1], [0, 0, 1, 1], [], []>} : vector<16x32xf32>, vector<32x8xf32>, vector<16x8xf32> -> vector<16x8xf32>
    %c2_65 = arith.constant 2 : index
    %c1_66 = arith.constant 1 : index
    %c0_67 = arith.constant 0 : index
    %c0_68 = arith.constant 0 : index
    %70 = vector.load %arg5[%c2_65, %c1_66, %c0_67, %c0_68] : memref<3x4x1x8xf32, #tpu.memory_space<vmem>>, vector<1x1x1x8xf32>
    %71 = vector.shape_cast %70 : vector<1x1x1x8xf32> to vector<1x8xf32>
    %72 = vector.broadcast %71 : vector<1x8xf32> to vector<16x8xf32>
    %73 = arith.addf %69, %72 : vector<16x8xf32>
    %cst_69 = arith.constant 0.353553385 : f32
    %74 = vector.broadcast %cst_69 : f32 to vector<16x8xf32>
    %75 = arith.mulf %59, %74 : vector<16x8xf32>
    %76 = vector.shape_cast %75 : vector<16x8xf32> to vector<2x8x8xf32>
    %77 = vector.shape_cast %66 : vector<16x8xf32> to vector<2x8x8xf32>
    %78 = vector.shape_cast %73 : vector<16x8xf32> to vector<2x8x8xf32>
    "tpu.trace_start"() <{level = 10 : i32, message = "bqd,bkd->bqk"}> : () -> ()
    %cst_70 = arith.constant dense<0.000000e+00> : vector<2x8x8xf32>
    %79 = tpu.matmul %76, %77, %cst_70 {dimension_numbers = #tpu.dot_dimension_numbers<[2], [2], [1], [1], [0, 0, 0, 1, 1, 1], [0], [0]>} : vector<2x8x8xf32>, vector<2x8x8xf32>, vector<2x8x8xf32> -> vector<2x8x8xf32>
    "tpu.trace_stop"() : () -> ()
    %cst_71 = arith.constant dense<0xFF800000> : vector<2x8xf32>
    %80 = vector.multi_reduction <maximumf>, %79, %cst_71 [2] : vector<2x8x8xf32> to vector<2x8xf32>
    %81 = vector.shape_cast %80 : vector<2x8xf32> to vector<2x8x1xf32>
    %82 = vector.broadcast %81 : vector<2x8x1xf32> to vector<2x8x8xf32>
    %83 = arith.subf %79, %82 : vector<2x8x8xf32>
    %84 = math.exp %83 : vector<2x8x8xf32>
    %cst_72 = arith.constant dense<0.000000e+00> : vector<2x8xf32>
    %85 = vector.multi_reduction <add>, %84, %cst_72 [2] : vector<2x8x8xf32> to vector<2x8xf32>
    %86 = vector.shape_cast %85 : vector<2x8xf32> to vector<2x8x1xf32>
    %87 = tpu.reciprocal %86 {approx = true} : vector<2x8x1xf32> -> vector<2x8x1xf32>
    %88 = vector.broadcast %87 : vector<2x8x1xf32> to vector<2x8x8xf32>
    %89 = arith.mulf %84, %88 : vector<2x8x8xf32>
    %90 = arith.addf %46, %89 : vector<2x8x8xf32>
    "tpu.trace_start"() <{level = 10 : i32, message = "bqk,bkd->bqd"}> : () -> ()
    %cst_73 = arith.constant dense<0.000000e+00> : vector<2x8x8xf32>
    %91 = tpu.matmul %89, %78, %cst_73 {dimension_numbers = #tpu.dot_dimension_numbers<[2], [1], [1], [2], [0, 0, 0, 1, 1, 2], [0], [0]>} : vector<2x8x8xf32>, vector<2x8x8xf32>, vector<2x8x8xf32> -> vector<2x8x8xf32>
    "tpu.trace_stop"() : () -> ()
    %92 = vector.shape_cast %91 : vector<2x8x8xf32> to vector<16x8xf32>
    %c1_74 = arith.constant 1 : index
    %c0_75 = arith.constant 0 : index
    %c0_76 = arith.constant 0 : index
    %93 = vector.load %arg6[%c1_74, %c0_75, %c0_76] : memref<4x8x32xf32, #tpu.memory_space<vmem>>, vector<1x8x32xf32>
    %94 = vector.shape_cast %93 : vector<1x8x32xf32> to vector<8x32xf32>
    %cst_77 = arith.constant dense<0.000000e+00> : vector<16x32xf32>
    %95 = tpu.matmul %92, %94, %cst_77 {dimension_numbers = #tpu.dot_dimension_numbers<[1], [0], [0], [1], [0, 0, 1, 1], [], []>} : vector<16x8xf32>, vector<8x32xf32>, vector<16x32xf32> -> vector<16x32xf32>
    %96 = arith.addf %52, %95 : vector<16x32xf32>
    %c0_78 = arith.constant 0 : index
    %c2_79 = arith.constant 2 : index
    %c0_80 = arith.constant 0 : index
    %c0_81 = arith.constant 0 : index
    %97 = vector.load %arg4[%c0_78, %c2_79, %c0_80, %c0_81] : memref<3x4x32x8xf32, #tpu.memory_space<vmem>>, vector<1x1x32x8xf32>
    %98 = vector.shape_cast %97 : vector<1x1x32x8xf32> to vector<32x8xf32>
    %cst_82 = arith.constant dense<0.000000e+00> : vector<16x8xf32>
    %99 = tpu.matmul %6, %98, %cst_82 {dimension_numbers = #tpu.dot_dimension_numbers<[1], [0], [0], [1], [0, 0, 1, 1], [], []>} : vector<16x32xf32>, vector<32x8xf32>, vector<16x8xf32> -> vector<16x8xf32>
    %c0_83 = arith.constant 0 : index
    %c2_84 = arith.constant 2 : index
    %c0_85 = arith.constant 0 : index
    %c0_86 = arith.constant 0 : index
    %100 = vector.load %arg5[%c0_83, %c2_84, %c0_85, %c0_86] : memref<3x4x1x8xf32, #tpu.memory_space<vmem>>, vector<1x1x1x8xf32>
    %101 = vector.shape_cast %100 : vector<1x1x1x8xf32> to vector<1x8xf32>
    %102 = vector.broadcast %101 : vector<1x8xf32> to vector<16x8xf32>
    %103 = arith.addf %99, %102 : vector<16x8xf32>
    %c1_87 = arith.constant 1 : index
    %c2_88 = arith.constant 2 : index
    %c0_89 = arith.constant 0 : index
    %c0_90 = arith.constant 0 : index
    %104 = vector.load %arg4[%c1_87, %c2_88, %c0_89, %c0_90] : memref<3x4x32x8xf32, #tpu.memory_space<vmem>>, vector<1x1x32x8xf32>
    %105 = vector.shape_cast %104 : vector<1x1x32x8xf32> to vector<32x8xf32>
    %cst_91 = arith.constant dense<0.000000e+00> : vector<16x8xf32>
    %106 = tpu.matmul %6, %105, %cst_91 {dimension_numbers = #tpu.dot_dimension_numbers<[1], [0], [0], [1], [0, 0, 1, 1], [], []>} : vector<16x32xf32>, vector<32x8xf32>, vector<16x8xf32> -> vector<16x8xf32>
    %c1_92 = arith.constant 1 : index
    %c2_93 = arith.constant 2 : index
    %c0_94 = arith.constant 0 : index
    %c0_95 = arith.constant 0 : index
    %107 = vector.load %arg5[%c1_92, %c2_93, %c0_94, %c0_95] : memref<3x4x1x8xf32, #tpu.memory_space<vmem>>, vector<1x1x1x8xf32>
    %108 = vector.shape_cast %107 : vector<1x1x1x8xf32> to vector<1x8xf32>
    %109 = vector.broadcast %108 : vector<1x8xf32> to vector<16x8xf32>
    %110 = arith.addf %106, %109 : vector<16x8xf32>
    %c2_96 = arith.constant 2 : index
    %c2_97 = arith.constant 2 : index
    %c0_98 = arith.constant 0 : index
    %c0_99 = arith.constant 0 : index
    %111 = vector.load %arg4[%c2_96, %c2_97, %c0_98, %c0_99] : memref<3x4x32x8xf32, #tpu.memory_space<vmem>>, vector<1x1x32x8xf32>
    %112 = vector.shape_cast %111 : vector<1x1x32x8xf32> to vector<32x8xf32>
    %cst_100 = arith.constant dense<0.000000e+00> : vector<16x8xf32>
    %113 = tpu.matmul %6, %112, %cst_100 {dimension_numbers = #tpu.dot_dimension_numbers<[1], [0], [0], [1], [0, 0, 1, 1], [], []>} : vector<16x32xf32>, vector<32x8xf32>, vector<16x8xf32> -> vector<16x8xf32>
    %c2_101 = arith.constant 2 : index
    %c2_102 = arith.constant 2 : index
    %c0_103 = arith.constant 0 : index
    %c0_104 = arith.constant 0 : index
    %114 = vector.load %arg5[%c2_101, %c2_102, %c0_103, %c0_104] : memref<3x4x1x8xf32, #tpu.memory_space<vmem>>, vector<1x1x1x8xf32>
    %115 = vector.shape_cast %114 : vector<1x1x1x8xf32> to vector<1x8xf32>
    %116 = vector.broadcast %115 : vector<1x8xf32> to vector<16x8xf32>
    %117 = arith.addf %113, %116 : vector<16x8xf32>
    %cst_105 = arith.constant 0.353553385 : f32
    %118 = vector.broadcast %cst_105 : f32 to vector<16x8xf32>
    %119 = arith.mulf %103, %118 : vector<16x8xf32>
    %120 = vector.shape_cast %119 : vector<16x8xf32> to vector<2x8x8xf32>
    %121 = vector.shape_cast %110 : vector<16x8xf32> to vector<2x8x8xf32>
    %122 = vector.shape_cast %117 : vector<16x8xf32> to vector<2x8x8xf32>
    "tpu.trace_start"() <{level = 10 : i32, message = "bqd,bkd->bqk"}> : () -> ()
    %cst_106 = arith.constant dense<0.000000e+00> : vector<2x8x8xf32>
    %123 = tpu.matmul %120, %121, %cst_106 {dimension_numbers = #tpu.dot_dimension_numbers<[2], [2], [1], [1], [0, 0, 0, 1, 1, 1], [0], [0]>} : vector<2x8x8xf32>, vector<2x8x8xf32>, vector<2x8x8xf32> -> vector<2x8x8xf32>
    "tpu.trace_stop"() : () -> ()
    %cst_107 = arith.constant dense<0xFF800000> : vector<2x8xf32>
    %124 = vector.multi_reduction <maximumf>, %123, %cst_107 [2] : vector<2x8x8xf32> to vector<2x8xf32>
    %125 = vector.shape_cast %124 : vector<2x8xf32> to vector<2x8x1xf32>
    %126 = vector.broadcast %125 : vector<2x8x1xf32> to vector<2x8x8xf32>
    %127 = arith.subf %123, %126 : vector<2x8x8xf32>
    %128 = math.exp %127 : vector<2x8x8xf32>
    %cst_108 = arith.constant dense<0.000000e+00> : vector<2x8xf32>
    %129 = vector.multi_reduction <add>, %128, %cst_108 [2] : vector<2x8x8xf32> to vector<2x8xf32>
    %130 = vector.shape_cast %129 : vector<2x8xf32> to vector<2x8x1xf32>
    %131 = tpu.reciprocal %130 {approx = true} : vector<2x8x1xf32> -> vector<2x8x1xf32>
    %132 = vector.broadcast %131 : vector<2x8x1xf32> to vector<2x8x8xf32>
    %133 = arith.mulf %128, %132 : vector<2x8x8xf32>
    %134 = arith.addf %90, %133 : vector<2x8x8xf32>
    "tpu.trace_start"() <{level = 10 : i32, message = "bqk,bkd->bqd"}> : () -> ()
    %cst_109 = arith.constant dense<0.000000e+00> : vector<2x8x8xf32>
    %135 = tpu.matmul %133, %122, %cst_109 {dimension_numbers = #tpu.dot_dimension_numbers<[2], [1], [1], [2], [0, 0, 0, 1, 1, 2], [0], [0]>} : vector<2x8x8xf32>, vector<2x8x8xf32>, vector<2x8x8xf32> -> vector<2x8x8xf32>
    "tpu.trace_stop"() : () -> ()
    %136 = vector.shape_cast %135 : vector<2x8x8xf32> to vector<16x8xf32>
    %c2_110 = arith.constant 2 : index
    %c0_111 = arith.constant 0 : index
    %c0_112 = arith.constant 0 : index
    %137 = vector.load %arg6[%c2_110, %c0_111, %c0_112] : memref<4x8x32xf32, #tpu.memory_space<vmem>>, vector<1x8x32xf32>
    %138 = vector.shape_cast %137 : vector<1x8x32xf32> to vector<8x32xf32>
    %cst_113 = arith.constant dense<0.000000e+00> : vector<16x32xf32>
    %139 = tpu.matmul %136, %138, %cst_113 {dimension_numbers = #tpu.dot_dimension_numbers<[1], [0], [0], [1], [0, 0, 1, 1], [], []>} : vector<16x8xf32>, vector<8x32xf32>, vector<16x32xf32> -> vector<16x32xf32>
    %140 = arith.addf %96, %139 : vector<16x32xf32>
    %c0_114 = arith.constant 0 : index
    %c3 = arith.constant 3 : index
    %c0_115 = arith.constant 0 : index
    %c0_116 = arith.constant 0 : index
    %141 = vector.load %arg4[%c0_114, %c3, %c0_115, %c0_116] : memref<3x4x32x8xf32, #tpu.memory_space<vmem>>, vector<1x1x32x8xf32>
    %142 = vector.shape_cast %141 : vector<1x1x32x8xf32> to vector<32x8xf32>
    %cst_117 = arith.constant dense<0.000000e+00> : vector<16x8xf32>
    %143 = tpu.matmul %6, %142, %cst_117 {dimension_numbers = #tpu.dot_dimension_numbers<[1], [0], [0], [1], [0, 0, 1, 1], [], []>} : vector<16x32xf32>, vector<32x8xf32>, vector<16x8xf32> -> vector<16x8xf32>
    %c0_118 = arith.constant 0 : index
    %c3_119 = arith.constant 3 : index
    %c0_120 = arith.constant 0 : index
    %c0_121 = arith.constant 0 : index
    %144 = vector.load %arg5[%c0_118, %c3_119, %c0_120, %c0_121] : memref<3x4x1x8xf32, #tpu.memory_space<vmem>>, vector<1x1x1x8xf32>
    %145 = vector.shape_cast %144 : vector<1x1x1x8xf32> to vector<1x8xf32>
    %146 = vector.broadcast %145 : vector<1x8xf32> to vector<16x8xf32>
    %147 = arith.addf %143, %146 : vector<16x8xf32>
    %c1_122 = arith.constant 1 : index
    %c3_123 = arith.constant 3 : index
    %c0_124 = arith.constant 0 : index
    %c0_125 = arith.constant 0 : index
    %148 = vector.load %arg4[%c1_122, %c3_123, %c0_124, %c0_125] : memref<3x4x32x8xf32, #tpu.memory_space<vmem>>, vector<1x1x32x8xf32>
    %149 = vector.shape_cast %148 : vector<1x1x32x8xf32> to vector<32x8xf32>
    %cst_126 = arith.constant dense<0.000000e+00> : vector<16x8xf32>
    %150 = tpu.matmul %6, %149, %cst_126 {dimension_numbers = #tpu.dot_dimension_numbers<[1], [0], [0], [1], [0, 0, 1, 1], [], []>} : vector<16x32xf32>, vector<32x8xf32>, vector<16x8xf32> -> vector<16x8xf32>
    %c1_127 = arith.constant 1 : index
    %c3_128 = arith.constant 3 : index
    %c0_129 = arith.constant 0 : index
    %c0_130 = arith.constant 0 : index
    %151 = vector.load %arg5[%c1_127, %c3_128, %c0_129, %c0_130] : memref<3x4x1x8xf32, #tpu.memory_space<vmem>>, vector<1x1x1x8xf32>
    %152 = vector.shape_cast %151 : vector<1x1x1x8xf32> to vector<1x8xf32>
    %153 = vector.broadcast %152 : vector<1x8xf32> to vector<16x8xf32>
    %154 = arith.addf %150, %153 : vector<16x8xf32>
    %c2_131 = arith.constant 2 : index
    %c3_132 = arith.constant 3 : index
    %c0_133 = arith.constant 0 : index
    %c0_134 = arith.constant 0 : index
    %155 = vector.load %arg4[%c2_131, %c3_132, %c0_133, %c0_134] : memref<3x4x32x8xf32, #tpu.memory_space<vmem>>, vector<1x1x32x8xf32>
    %156 = vector.shape_cast %155 : vector<1x1x32x8xf32> to vector<32x8xf32>
    %cst_135 = arith.constant dense<0.000000e+00> : vector<16x8xf32>
    %157 = tpu.matmul %6, %156, %cst_135 {dimension_numbers = #tpu.dot_dimension_numbers<[1], [0], [0], [1], [0, 0, 1, 1], [], []>} : vector<16x32xf32>, vector<32x8xf32>, vector<16x8xf32> -> vector<16x8xf32>
    %c2_136 = arith.constant 2 : index
    %c3_137 = arith.constant 3 : index
    %c0_138 = arith.constant 0 : index
    %c0_139 = arith.constant 0 : index
    %158 = vector.load %arg5[%c2_136, %c3_137, %c0_138, %c0_139] : memref<3x4x1x8xf32, #tpu.memory_space<vmem>>, vector<1x1x1x8xf32>
    %159 = vector.shape_cast %158 : vector<1x1x1x8xf32> to vector<1x8xf32>
    %160 = vector.broadcast %159 : vector<1x8xf32> to vector<16x8xf32>
    %161 = arith.addf %157, %160 : vector<16x8xf32>
    %cst_140 = arith.constant 0.353553385 : f32
    %162 = vector.broadcast %cst_140 : f32 to vector<16x8xf32>
    %163 = arith.mulf %147, %162 : vector<16x8xf32>
    %164 = vector.shape_cast %163 : vector<16x8xf32> to vector<2x8x8xf32>
    %165 = vector.shape_cast %154 : vector<16x8xf32> to vector<2x8x8xf32>
    %166 = vector.shape_cast %161 : vector<16x8xf32> to vector<2x8x8xf32>
    "tpu.trace_start"() <{level = 10 : i32, message = "bqd,bkd->bqk"}> : () -> ()
    %cst_141 = arith.constant dense<0.000000e+00> : vector<2x8x8xf32>
    %167 = tpu.matmul %164, %165, %cst_141 {dimension_numbers = #tpu.dot_dimension_numbers<[2], [2], [1], [1], [0, 0, 0, 1, 1, 1], [0], [0]>} : vector<2x8x8xf32>, vector<2x8x8xf32>, vector<2x8x8xf32> -> vector<2x8x8xf32>
    "tpu.trace_stop"() : () -> ()
    %cst_142 = arith.constant dense<0xFF800000> : vector<2x8xf32>
    %168 = vector.multi_reduction <maximumf>, %167, %cst_142 [2] : vector<2x8x8xf32> to vector<2x8xf32>
    %169 = vector.shape_cast %168 : vector<2x8xf32> to vector<2x8x1xf32>
    %170 = vector.broadcast %169 : vector<2x8x1xf32> to vector<2x8x8xf32>
    %171 = arith.subf %167, %170 : vector<2x8x8xf32>
    %172 = math.exp %171 : vector<2x8x8xf32>
    %cst_143 = arith.constant dense<0.000000e+00> : vector<2x8xf32>
    %173 = vector.multi_reduction <add>, %172, %cst_143 [2] : vector<2x8x8xf32> to vector<2x8xf32>
    %174 = vector.shape_cast %173 : vector<2x8xf32> to vector<2x8x1xf32>
    %175 = tpu.reciprocal %174 {approx = true} : vector<2x8x1xf32> -> vector<2x8x1xf32>
    %176 = vector.broadcast %175 : vector<2x8x1xf32> to vector<2x8x8xf32>
    %177 = arith.mulf %172, %176 : vector<2x8x8xf32>
    %178 = arith.addf %134, %177 : vector<2x8x8xf32>
    "tpu.trace_start"() <{level = 10 : i32, message = "bqk,bkd->bqd"}> : () -> ()
    %cst_144 = arith.constant dense<0.000000e+00> : vector<2x8x8xf32>
    %179 = tpu.matmul %177, %166, %cst_144 {dimension_numbers = #tpu.dot_dimension_numbers<[2], [1], [1], [2], [0, 0, 0, 1, 1, 2], [0], [0]>} : vector<2x8x8xf32>, vector<2x8x8xf32>, vector<2x8x8xf32> -> vector<2x8x8xf32>
    "tpu.trace_stop"() : () -> ()
    %180 = vector.shape_cast %179 : vector<2x8x8xf32> to vector<16x8xf32>
    %c3_145 = arith.constant 3 : index
    %c0_146 = arith.constant 0 : index
    %c0_147 = arith.constant 0 : index
    %181 = vector.load %arg6[%c3_145, %c0_146, %c0_147] : memref<4x8x32xf32, #tpu.memory_space<vmem>>, vector<1x8x32xf32>
    %182 = vector.shape_cast %181 : vector<1x8x32xf32> to vector<8x32xf32>
    %cst_148 = arith.constant dense<0.000000e+00> : vector<16x32xf32>
    %183 = tpu.matmul %180, %182, %cst_148 {dimension_numbers = #tpu.dot_dimension_numbers<[1], [0], [0], [1], [0, 0, 1, 1], [], []>} : vector<16x8xf32>, vector<8x32xf32>, vector<16x32xf32> -> vector<16x32xf32>
    %184 = arith.addf %140, %183 : vector<16x32xf32>
    %c0_149 = arith.constant 0 : index
    %c0_150 = arith.constant 0 : index
    %185 = vector.load %arg7[%c0_149, %c0_150] : memref<1x32xf32, #tpu.memory_space<vmem>>, vector<1x32xf32>
    %186 = vector.broadcast %185 : vector<1x32xf32> to vector<16x32xf32>
    %187 = arith.addf %184, %186 : vector<16x32xf32>
    %188 = vector.shape_cast %187 : vector<16x32xf32> to vector<2x8x32xf32>
    %c0_151 = arith.constant 0 : index
    %c0_152 = arith.constant 0 : index
    %c0_153 = arith.constant 0 : index
    %189 = vector.load %arg8[%c0_151, %c0_152, %c0_153] : memref<2x8x32xf32, #tpu.memory_space<vmem>>, vector<2x8x32xf32>
    tpu.vector_store %arg8[%c0_151, %c0_152, %c0_153], %188 {strides = array<i32>} : memref<2x8x32xf32, #tpu.memory_space<vmem>>, vector<2x8x32xf32>,
    %cst_154 = arith.constant 2.500000e-01 : f32
    %190 = vector.broadcast %cst_154 : f32 to vector<2x8x8xf32>
    %191 = arith.mulf %178, %190 : vector<2x8x8xf32>
    %c0_155 = arith.constant 0 : index
    %c0_156 = arith.constant 0 : index
    %c0_157 = arith.constant 0 : index
    %192 = vector.load %arg9[%c0_155, %c0_156, %c0_157] : memref<2x8x8xf32, #tpu.memory_space<vmem>>, vector<2x8x8xf32>
    tpu.vector_store %arg9[%c0_155, %c0_156, %c0_157], %191 {strides = array<i32>} : memref<2x8x8xf32, #tpu.memory_space<vmem>>, vector<2x8x8xf32>,
    return
  }
  func.func @transform_0(%arg0: i32) -> (i32, i32, i32) {
    %c0_i32 = arith.constant 0 : i32
    %c0_i32_0 = arith.constant 0 : i32
    %c0_i32_1 = arith.constant 0 : i32
    return %arg0, %c0_i32, %c0_i32_0 : i32, i32, i32
  }
  func.func @transform_1(%arg0: i32) -> (i32, i32) {
    %c0_i32 = arith.constant 0 : i32
    %c0_i32_0 = arith.constant 0 : i32
    %c0_i32_1 = arith.constant 0 : i32
    return %c0_i32, %c0_i32_0 : i32, i32
  }
  func.func @transform_2(%arg0: i32) -> (i32, i32) {
    %c0_i32 = arith.constant 0 : i32
    %c0_i32_0 = arith.constant 0 : i32
    %c0_i32_1 = arith.constant 0 : i32
    return %c0_i32, %c0_i32_0 : i32, i32
  }
  func.func @transform_3(%arg0: i32) -> (i32, i32, i32, i32) {
    %c0_i32 = arith.constant 0 : i32
    %c0_i32_0 = arith.constant 0 : i32
    %c0_i32_1 = arith.constant 0 : i32
    %c0_i32_2 = arith.constant 0 : i32
    %c0_i32_3 = arith.constant 0 : i32
    return %c0_i32, %c0_i32_0, %c0_i32_1, %c0_i32_2 : i32, i32, i32, i32
  }
  func.func @transform_4(%arg0: i32) -> (i32, i32, i32, i32) {
    %c0_i32 = arith.constant 0 : i32
    %c0_i32_0 = arith.constant 0 : i32
    %c0_i32_1 = arith.constant 0 : i32
    %c0_i32_2 = arith.constant 0 : i32
    %c0_i32_3 = arith.constant 0 : i32
    return %c0_i32, %c0_i32_0, %c0_i32_1, %c0_i32_2 : i32, i32, i32, i32
  }
  func.func @transform_5(%arg0: i32) -> (i32, i32, i32) {
    %c0_i32 = arith.constant 0 : i32
    %c0_i32_0 = arith.constant 0 : i32
    %c0_i32_1 = arith.constant 0 : i32
    %c0_i32_2 = arith.constant 0 : i32
    return %c0_i32, %c0_i32_0, %c0_i32_1 : i32, i32, i32
  }
  func.func @transform_6(%arg0: i32) -> (i32, i32) {
    %c0_i32 = arith.constant 0 : i32
    %c0_i32_0 = arith.constant 0 : i32
    %c0_i32_1 = arith.constant 0 : i32
    return %c0_i32, %c0_i32_0 : i32, i32
  }
  func.func @transform_7(%arg0: i32) -> (i32, i32, i32) {
    %c0_i32 = arith.constant 0 : i32
    %c0_i32_0 = arith.constant 0 : i32
    %c0_i32_1 = arith.constant 0 : i32
    return %arg0, %c0_i32, %c0_i32_0 : i32, i32, i32
  }
  func.func @transform_8(%arg0: i32) -> (i32, i32, i32) {
    %c0_i32 = arith.constant 0 : i32
    %c0_i32_0 = arith.constant 0 : i32
    %c0_i32_1 = arith.constant 0 : i32
    return %arg0, %c0_i32, %c0_i32_0 : i32, i32, i32
  }
}

</mosaic_0001>

<bundles_post_ra>
// kernel: tpu_custom_call.1
= control target key start
LH: loop header
LB: loop body
LE: loop exit
PB: predicated region body
PF: predicated region fallthrough
CT: control target
= control target key end

     0   :  { %14 = vsyncpa [#allocation3], 0  ;;  %vm41_vm0 = vcmask 130048   ;;  %s4011_s0 = inlined_call_operand.vmem [shape: f32[2,8,16], index: 0, kind: input, shape index: {}]   ;;  %s4012_s1 = inlined_call_operand.vmem [shape: f32[16,32], index: 1, kind: input, shape index: {}]   ;;  %s4013_s2 = inlined_call_operand.vmem [shape: f32[1,32], index: 2, kind: input, shape index: {}]   ;;  %s4014_s3 = inlined_call_operand.vmem [shape: f32[3,4,32,8], index: 3, kind: input, shape index: {}]   ;;  %s4015_s4 = inlined_call_operand.vmem [shape: f32[3,4,1,8], index: 4, kind: input, shape index: {}]   ;;  %s4016_s5 = inlined_call_operand.vmem [shape: f32[4,8,32], index: 5, kind: input, shape index: {}]   ;;  %s4017_s6 = inlined_call_operand.vmem [shape: f32[1,32], index: 6, kind: input, shape index: {}]   ;;  %s4018_s7 = inlined_call_operand.hbm [shape: f32[2,8,32], index: 7, kind: output, shape index: {0}]   ;;  %s4019_s8 = inlined_call_operand.hbm [shape: f32[2,8,8], index: 8, kind: output, shape index: {1}]  }
   0x1   :  { %v32_v0 = vld [vmem:[%s4012_s1] sm:$0xff]  ;;  %v33_v1 = vld [vmem:[%s4012_s1 + $0x8] sm:$0xff] }
   0x2   :  { %v30_v2 = vld [vmem:[%s4011_s0] sm:$0xff]  ;;  %v3352_v3 = vpack.c.bf16 %v33_v1, %v32_v0  ;;  %v124_v5 = vld [vmem:[%s4014_s3 + $0x8] sm:$0xff] }
   0x3   :  { %3117 = vmatprep.mubr.msk.f32.mxu0 %vm41_vm0, %v30_v2  ;;  %v123_v4 = vld [vmem:[%s4014_s3] sm:$0xff]  ;;  %v2870_v8 = vld [vmem:[%s4014_s3 + $0x88] sm:$0xff] }
   0x4   :  { %v3356_v6 = vpack.c.bf16 %v124_v5, %v123_v4  ;;  %v2869_v7 = vld [vmem:[%s4014_s3 + $0x80] sm:$0xff] }
   0x5   :  { %15 = vsyncpa [#allocation5], 0  ;;  %3353 = vmatprep.subr.bf16.mxu0 %v3352_v3  ;;  %v3364_v9 = vpack.c.bf16 %v2870_v8, %v2869_v7  ;;  %v31_v10 = vld [vmem:[%s4011_s0 + $0x8] sm:$0xff]  ;;  %v125_v11 = vld [vmem:[%s4014_s3 + $0x10] sm:$0xff]  ;;  %vm134_vm1 = vcmask 261120   ;;  %v3544_v28 = vmov 0.0  }
   0x6   :  { %3355 = vmatpush3.bf16.msra.mxu0 %v3352_v3  ;;  %3357 = vmatprep.subr.bf16.mxu1 %v3356_v6  ;;  %v126_v12 = vld [vmem:[%s4014_s3 + $0x18] sm:$0xff]  ;;  %v2871_v14 = vld [vmem:[%s4014_s3 + $0x90] sm:$0xff]  ;;  %v2877_v17 = vld [vmem:[%s4014_s3 + $0x100] sm:$0xff]  ;;  %vm3545_vm2 = vmmov 0   ;;  %vm394_vm3 = vcmask 64512   ;;  %s3546_s16 = smov [#allocation4]  }
   0x7   :  { %3359 = vmatpush3.bf16.msra.mxu1 %v3356_v6  ;;  %3365 = vmatprep.subr.bf16.mxu0 %v3364_v9  ;;  %v3360_v13 = vpack.c.bf16 %v126_v12, %v125_v11  ;;  %v2872_v15 = vld [vmem:[%s4014_s3 + $0x98] sm:$0xff]  ;;  %v2878_v18 = vld [vmem:[%s4014_s3 + $0x108] sm:$0xff]  ;;  %v2863_v20 = vld [vmem:[%s4013_s2] ss:$0 sm:$0xff]  ;;  %s2848_s1 = sshll.u32 %s3546_s16, 4  ;;  %s2849_s1 = int_to_ptr.vmem [resolvable:$true] %s2848_s1 }
   0x8   :  { %v3368_v16 = vpack.c.bf16 %v2872_v15, %v2871_v14  ;;  %v3372_v19 = vpack.c.bf16 %v2878_v18, %v2877_v17  ;;  %v2879_v22 = vld [vmem:[%s4014_s3 + $0x110] sm:$0xff]  ;;  %v2880_v23 = vld [vmem:[%s4014_s3 + $0x118] sm:$0xff]  ;;  %v2866_v29 = vld [vmem:[%s4015_s4] ss:$0 sm:$0xff]  ;;  %s3496_s17 = scalar_lea.vmem %s2849_s1, 256  ;;  %p3501_p1 = scmp.lt.s32.totalorder %s2849_s1, %s2849_s1 }
   0x9   :  { %3118 = vmatmul.mubr.msk.f32.vlgmr.msra.gmra.mrb[0].mxu0 %vm41_vm0, %v31_v10  ;;  %3361 = vmatprep.subr.bf16.mxu1 %v3360_v13  ;;  %v3376_v27 = vpack.c.bf16 %v2880_v23, %v2879_v22  ;;  %v2874_v30 = vld [vmem:[%s4015_s4 + $0x4] ss:$0 sm:$0xff]  ;;  %v2882_v40 = vld [vmem:[%s4015_s4 + $0x8] ss:$0 sm:$0xff]  ;;  %v2901_v6 = vld [vmem:[%s4014_s3 + $0xb0] sm:$0xff]  ;;  %p3497_p0 = scmp.ne.s32.totalorder %s2849_s1, %s3496_s17  ;;  %p3502_p2 = scmp.lt.s32.totalorder %s3496_s17, %s3496_s17 }
   0xa   :  { %3367 = vmatpush3.bf16.msra.mxu0 %v3364_v9  ;;  %v2899_v62 = vld [vmem:[%s4014_s3 + $0xa0] sm:$0xff]  ;;  %v2900_v63 = vld [vmem:[%s4014_s3 + $0xa8] sm:$0xff]  ;;  %v2902_v7 = vld [vmem:[%s4014_s3 + $0xb8] sm:$0xff] }
   0xb   :  { %3363 = vmatpush3.bf16.msra.mxu1 %v3360_v13  ;;  %3369 = vmatprep.subr.bf16.mxu0 %v3368_v16  ;;  %v3388_v0 = vpack.c.bf16 %v2900_v63, %v2899_v62  ;;  %v2891_v1 = vld [vmem:[%s4014_s3 + $0x20] sm:$0xff]  ;;  %v2892_v2 = vld [vmem:[%s4014_s3 + $0x28] sm:$0xff]  ;;  %v3392_v10 = vpack.c.bf16 %v2902_v7, %v2901_v6  ;;  %v2893_v11 = vld [vmem:[%s4014_s3 + $0x30] sm:$0xff]  ;;  %p3503_p3 = por %p3502_p2, %p3501_p1 }
   0xc   :  { %3373 = vmatprep.subr.bf16.mxu1 %v3372_v19  ;;  %v3380_v3 = vpack.c.bf16 %v2892_v2, %v2891_v1  ;;  %v2894_v12 = vld [vmem:[%s4014_s3 + $0x38] sm:$0xff]  ;;  %v2908_v17 = vld [vmem:[%s4014_s3 + $0x128] sm:$0xff]  ;;  %v2926_v62 = vld [vmem:[%s4014_s3 + $0x40] sm:$0xff] }
   0xd   :  { %v3384_v15 = vpack.c.bf16 %v2894_v12, %v2893_v11  ;;  %v2927_v63 = vld [vmem:[%s4014_s3 + $0x48] sm:$0xff]  ;;  %v2929_v6 = vld [vmem:[%s4014_s3 + $0x58] sm:$0xff]  ;;  %v2942_v11 = vld [vmem:[%s4014_s3 + $0x140] sm:$0xff]  ;;  %p3504_p4 = pnand %p3503_p3, %p3497_p0 }
   0xe   :  { %3371 = vmatpush3.bf16.msra.mxu0 %v3368_v16  ;;  %v2907_v16 = vld [vmem:[%s4014_s3 + $0x120] sm:$0xff]  ;;  %v2943_v12 = vld [vmem:[%s4014_s3 + $0x148] sm:$0xff] }
   0xf   :  { %3153 = vmatprep.subr.mxu0 %v3544_v28  ;;  %v3396_v18 = vpack.c.bf16 %v2908_v17, %v2907_v16  ;;  %v2945_v16 = vld [vmem:[%s4014_s3 + $0x158] sm:$0xff] }
  0xdc   :  { %v3119_v21 = vpop.f32.mrb[0].mxu0 }
  0xdd   :  { %v114_v24 = vpop.f32.mrb[1].mxu0  ;;  %v3650_v26 = vadd.f32 %v3119_v21, %v2863_v20 }
  0xde   :  { %v3648_v25 = vadd.f32 %v2863_v20, %v114_v24  ;;  %v2910_v20 = vld [vmem:[%s4014_s3 + $0x138] sm:$0xff] }
  0xe0   :  { %3128 = vmatprep.mubr.msk.f32.mxu1 %vm134_vm1, %v3648_v25  ;;  %3139 = vmatprep.mubr.msk.f32.mxu0 %vm134_vm1, %v3648_v25 }
  0xe1   :  { %3129 = vmatmul.mubr.msk.f32.vlgmr.msra.gmra.mrb[0].mxu1 %vm134_vm1, %v3650_v26  ;;  %3140 = vmatmul.mubr.msk.f32.vlgmr.msra.gmra.mrb[2].mxu0 %vm134_vm1, %v3650_v26 }
  0xe2   :  { %3375 = vmatpush3.bf16.msra.mxu1 %v3372_v19  ;;  %3150 = vmatprep.mubr.msk.f32.mxu1 %vm134_vm1, %v3648_v25  ;;  %v2909_v19 = vld [vmem:[%s4014_s3 + $0x130] sm:$0xff] }
  0xe3   :  { %3377 = vmatprep.subr.bf16.mxu1 %v3376_v27  ;;  %3155 = vmatprep.mubr.msk.f32.mxu0 %vm3545_vm2, %v3544_v28  ;;  %v3400_v21 = vpack.c.bf16 %v2910_v20, %v2909_v19  ;;  %v717_v19 = vld [vmem:[%s4016_s5] sm:$0xff] }
  0xe6   :  { %3379 = vmatpush3.bf16.msra.mxu1 %v3376_v27 }
  0xe7   :  { %3163 = vmatprep.subr.mxu1 %v3544_v28 }
  0xe9   :  { %3151 = vmatmul.mubr.msk.f32.vlgmr.msra.gmra.mrb[2].mxu1 %vm134_vm1, %v3650_v26 }
  0xea   :  { %3165 = vmatprep.mubr.msk.f32.mxu1 %vm3545_vm2, %v3544_v28 }
 0x1b4   :  { %v3130_v31 = vpop.f32.mrb[0].mxu1  ;;  %v3141_v32 = vpop.f32.mrb[2].mxu0 }
 0x1b5   :  { %v207_v33 = vpop.f32.mrb[1].mxu1  ;;  %v295_v34 = vpop.f32.mrb[3].mxu0  ;;  %v213_v38 = vadd.f32 %v3130_v31, %v2866_v29  ;;  %v301_v39 = vadd.f32 %v3141_v32, %v2874_v30 }
 0x1b6   :  { %v208_v35 = vadd.f32 %v2866_v29, %v207_v33  ;;  %v296_v36 = vadd.f32 %v2874_v30, %v295_v34  ;;  %v2904_v29 = vld [vmem:[%s4015_s4 + $0x5] ss:$0 sm:$0xff]  ;;  %v2896_v33 = vld [vmem:[%s4015_s4 + $0x1] ss:$0 sm:$0xff] }
 0x1b7   :  { %v393_v42 = vmul.f32 0.35355338, %v213_v38 }
 0x1b8   :  { %v392_v37 = vmul.f32 0.35355338, %v208_v35  ;;  %3154 = vmatpush3.xpose.msk.msra.mxu0 %vm394_vm3, %v296_v36 }
 0x1b9   :  { %3158 = vmatprep.subr.mxu0 %v3544_v28 }
 0x1bb   :  { %3156 = vmatmul.mubr.msk.f32.vlgmr.msra.gmra.mrb[4].mxu0 %vm394_vm3, %v392_v37 }
 0x1bc   :  { %v3152_v41 = vpop.f32.mrb[2].mxu1  ;;  %3159 = vmatpush3.xpose.msk.msra.mxu0 %vm394_vm3, %v301_v39  ;;  %3160 = vmatprep.mubr.msk.f32.mxu0 %vm3545_vm2, %v3544_v28 }
 0x1bd   :  { %v383_v43 = vpop.f32.mrb[3].mxu1  ;;  %3168 = vmatprep.subr.mxu0 %v3544_v28  ;;  %v389_v44 = vadd.f32 %v3152_v41, %v2882_v40 }
 0x1be   :  { %v384_v45 = vadd.f32 %v2882_v40, %v383_v43  ;;  %v2912_v40 = vld [vmem:[%s4015_s4 + $0x9] ss:$0 sm:$0xff] }
 0x1bf   :  { %3161 = vmatmul.mubr.msk.f32.vlgmr.msra.gmra.mrb[6].mxu0 %vm394_vm3, %v393_v42 }
 0x1c0   :  { %3164 = vmatpush3.msra.mxu1 %v384_v45  ;;  %3169 = vmatpush3.msra.mxu0 %v389_v44 }
 0x1c1   :  { %3170 = vmatprep.mubr.msk.f32.mxu0 %vm3545_vm2, %v3544_v28  ;;  %3389 = vmatprep.subr.bf16.mxu0 %v3388_v0 }
 0x1c2   :  { %3381 = vmatprep.subr.bf16.mxu1 %v3380_v3 }
 0x28e   :  { %v467_v46 = vpop.f32.mrb[4].mxu0 }
 0x28f   :  { %v3157_v47 = vpop.f32.mrb[5].mxu0  ;;  %v547_v51 = vsel %vm394_vm3, %v467_v46, -inf }
 0x292   :  { %v543_v48 = vpop.f32.mrb[6].mxu0 }
 0x293   :  { %v3162_v49 = vpop.f32.mrb[7].mxu0  ;;  %v550_v50 = vsel %vm394_vm3, %v543_v48, -inf }
 0x294   :  { %551 = vmax.xlane.f32.xlu0 %v550_v50 }
 0x298   :  { %548 = vmax.xlane.f32.xlu0 %v547_v51 }
 0x321   :  { %v552_v52 = vpop.xlane.xlu0 %551 }
 0x322   :  { %v554_v53 = vsub.f32 %v543_v48, %v552_v52 }
 0x324   :  { %v557_v54 = vmul.f32 1.442695, %v554_v53 }
 0x325   :  { %v549_v55 = vpop.xlane.xlu0 %548 }
 0x326   :  { %3464 = vpow2.f32 %v557_v54  ;;  %v553_v56 = vsub.f32 %v467_v46, %v549_v55 }
 0x328   :  { %v555_v57 = vmul.f32 1.442695, %v553_v56 }
 0x32a   :  { %3466 = vpow2.f32 %v555_v57 }
 0x330   :  { %v3465_v58 = vpop.eup %3464 }
 0x331   :  { %v562_v59 = vsel %vm394_vm3, %v3465_v58, 0.0 }
 0x332   :  { %563 = vadd.xlane.f32.xlu1 %v562_v59 }
 0x334   :  { %v3467_v60 = vpop.eup %3466 }
 0x335   :  { %v559_v61 = vsel %vm394_vm3, %v3467_v60, 0.0 }
 0x336   :  { %560 = vadd.xlane.f32.xlu1 %v559_v61 }
 0x3bf   :  { %v564_v4 = vpop.xlane.xlu1 %563 }
 0x3c0   :  { %3468 = vrcp.f32 %v564_v4 }
 0x3c3   :  { %v561_v5 = vpop.xlane.xlu1 %560 }
 0x3c4   :  { %3470 = vrcp.f32 %v561_v5  ;;  %v2928_v5 = vld [vmem:[%s4014_s3 + $0x50] sm:$0xff] }
 0x3ca   :  { %v3469_v8 = vpop.eup %3468 }
 0x3cb   :  { %v3711_v9 = vmul.f32 %v3469_v8, %v3465_v58 }
 0x3cd   :  { %3171 = vmatmul.mubr.msk.f32.vlgmr.msra.gmra.mrb[8].mxu0 %vm394_vm3, %v3711_v9 }
 0x3ce   :  { %v3471_v13 = vpop.eup %3470  ;;  %3391 = vmatpush3.bf16.msra.mxu0 %v3388_v0  ;;  %3192 = vmatprep.mubr.msk.f32.mxu0 %vm134_vm1, %v3648_v25  ;;  %v3404_v0 = vpack.c.bf16 %v2927_v63, %v2926_v62 }
 0x3cf   :  { %v3723_v14 = vmul.f32 %v3471_v13, %v3467_v60  ;;  %3393 = vmatprep.subr.bf16.mxu0 %v3392_v10  ;;  %v3420_v13 = vpack.c.bf16 %v2943_v12, %v2942_v11  ;;  %v2961_v11 = vld [vmem:[%s4014_s3 + $0x70] sm:$0xff]  ;;  %v2962_v12 = vld [vmem:[%s4014_s3 + $0x78] sm:$0xff] }
 0x3d1   :  { %3166 = vmatmul.mubr.msk.f32.vlgmr.msra.gmra.mrb[4].mxu1 %vm394_vm3, %v3723_v14 }
 0x3d2   :  { %3383 = vmatpush3.bf16.msra.mxu1 %v3380_v3  ;;  %3395 = vmatpush3.bf16.msra.mxu0 %v3392_v10  ;;  %v3408_v10 = vpack.c.bf16 %v2929_v6, %v2928_v5  ;;  %v2956_v6 = vld [vmem:[%s4016_s5 + $0x10] sm:$0xff] }
 0x3d3   :  { %3181 = vmatprep.mubr.msk.f32.mxu1 %vm134_vm1, %v3648_v25  ;;  %3385 = vmatprep.subr.bf16.mxu1 %v3384_v15 }
 0x3d4   :  { %3206 = vmatprep.subr.mxu0 %v3544_v28 }
 0x3d5   :  { %3193 = vmatmul.mubr.msk.f32.vlgmr.msra.gmra.mrb[10].mxu0 %vm134_vm1, %v3650_v26 }
 0x3d6   :  { %3387 = vmatpush3.bf16.msra.mxu1 %v3384_v15  ;;  %3208 = vmatprep.mubr.msk.f32.mxu0 %vm3545_vm2, %v3544_v28  ;;  %v2944_v15 = vld [vmem:[%s4014_s3 + $0x150] sm:$0xff] }
 0x3d7   :  { %3397 = vmatprep.subr.bf16.mxu1 %v3396_v18  ;;  %v3424_v17 = vpack.c.bf16 %v2945_v16, %v2944_v15 }
 0x3d9   :  { %3182 = vmatmul.mubr.msk.f32.vlgmr.msra.gmra.mrb[6].mxu1 %vm134_vm1, %v3650_v26 }
 0x3da   :  { %3399 = vmatpush3.bf16.msra.mxu1 %v3396_v18  ;;  %3203 = vmatprep.mubr.msk.f32.mxu1 %vm134_vm1, %v3648_v25  ;;  %v2921_v18 = vld [vmem:[%s4016_s5 + $0x8] sm:$0xff] }
 0x3db   :  { %3401 = vmatprep.subr.bf16.mxu1 %v3400_v21 }
 0x3de   :  { %3403 = vmatpush3.bf16.msra.mxu1 %v3400_v21  ;;  %v2934_v21 = vld [vmem:[%s4014_s3 + $0xc0] sm:$0xff] }
 0x3df   :  { %3216 = vmatprep.subr.mxu1 %v3544_v28 }
 0x3e1   :  { %3204 = vmatmul.mubr.msk.f32.vlgmr.msra.gmra.mrb[8].mxu1 %vm134_vm1, %v3650_v26 }
 0x3e2   :  { %3218 = vmatprep.mubr.msk.f32.mxu1 %vm3545_vm2, %v3544_v28 }
 0x4a0   :  { %v3755_v22 = vpop.f32.mrb[8].mxu0 }
 0x4a1   :  { %v3172_v23 = vpop.f32.mrb[9].mxu0 }
 0x4a2   :  { %v2935_v23 = vld [vmem:[%s4014_s3 + $0xc8] sm:$0xff] }
 0x4a4   :  { %v3757_v24 = vpop.f32.mrb[4].mxu1 }
 0x4a5   :  { %v3167_v27 = vpop.f32.mrb[5].mxu1 }
 0x4a8   :  { %v3194_v30 = vpop.f32.mrb[10].mxu0 }
 0x4a9   :  { %v885_v31 = vpop.f32.mrb[11].mxu0  ;;  %v891_v39 = vadd.f32 %v3194_v30, %v2904_v29 }
 0x4aa   :  { %v886_v32 = vadd.f32 %v2904_v29, %v885_v31  ;;  %v3412_v29 = vpack.c.bf16 %v2935_v23, %v2934_v21  ;;  %v2975_v21 = vld [vmem:[%s4014_s3 + $0x160] sm:$0xff]  ;;  %v2976_v23 = vld [vmem:[%s4014_s3 + $0x168] sm:$0xff] }
 0x4ac   :  { %v3183_v34 = vpop.f32.mrb[6].mxu1  ;;  %3207 = vmatpush3.xpose.msk.msra.mxu0 %vm394_vm3, %v886_v32  ;;  %v2936_v32 = vld [vmem:[%s4014_s3 + $0xd0] sm:$0xff] }
 0x4ad   :  { %v797_v35 = vpop.f32.mrb[7].mxu1  ;;  %3211 = vmatprep.subr.mxu0 %v3544_v28  ;;  %v803_v37 = vadd.f32 %v3183_v34, %v2896_v33 }
 0x4ae   :  { %v798_v36 = vadd.f32 %v2896_v33, %v797_v35  ;;  %v2937_v33 = vld [vmem:[%s4014_s3 + $0xd8] sm:$0xff] }
 0x4af   :  { %v983_v41 = vmul.f32 0.35355338, %v803_v37  ;;  %v3416_v34 = vpack.c.bf16 %v2937_v33, %v2936_v32  ;;  %v2969_v33 = vld [vmem:[%s4014_s3 + $0xf0] sm:$0xff] }
 0x4b0   :  { %v982_v38 = vmul.f32 0.35355338, %v798_v36 }
 0x4b2   :  { %3209 = vmatmul.mubr.msk.f32.vlgmr.msra.gmra.mrb[12].mxu0 %vm394_vm3, %v982_v38  ;;  %v2939_v38 = vld [vmem:[%s4015_s4 + $0x6] ss:$0 sm:$0xff] }
 0x4b3   :  { %3212 = vmatpush3.xpose.msk.msra.mxu0 %vm394_vm3, %v891_v39  ;;  %3213 = vmatprep.mubr.msk.f32.mxu0 %vm3545_vm2, %v3544_v28 }
 0x4b4   :  { %v3205_v42 = vpop.f32.mrb[8].mxu1  ;;  %3221 = vmatprep.subr.mxu0 %v3544_v28 }
 0x4b5   :  { %v979_v43 = vadd.f32 %v3205_v42, %v2912_v40  ;;  %v973_v44 = vpop.f32.mrb[9].mxu1 }
 0x4b6   :  { %v974_v45 = vadd.f32 %v2912_v40, %v973_v44  ;;  %3214 = vmatmul.mubr.msk.f32.vlgmr.msra.gmra.mrb[14].mxu0 %vm394_vm3, %v983_v41  ;;  %v2947_v44 = vld [vmem:[%s4015_s4 + $0xa] ss:$0 sm:$0xff] }
 0x4b7   :  { %3222 = vmatpush3.msra.mxu0 %v979_v43  ;;  %3223 = vmatprep.mubr.msk.f32.mxu0 %vm3545_vm2, %v3544_v28 }
 0x4b8   :  { %3217 = vmatpush3.msra.mxu1 %v974_v45  ;;  %3405 = vmatprep.subr.bf16.mxu0 %v3404_v0 }
 0x4b9   :  { %3226 = vmatprep.subr.mxu1 %v2921_v18 }
 0x585   :  { %v1056_v46 = vpop.f32.mrb[12].mxu0 }
 0x586   :  { %v3210_v47 = vpop.f32.mrb[13].mxu0  ;;  %v1136_v48 = vsel %vm394_vm3, %v1056_v46, -inf }
 0x587   :  { %1137 = vmax.xlane.f32.xlu0 %v1136_v48 }
 0x589   :  { %v1132_v49 = vpop.f32.mrb[14].mxu0 }
 0x58a   :  { %v3215_v50 = vpop.f32.mrb[15].mxu0  ;;  %v1139_v51 = vsel %vm394_vm3, %v1132_v49, -inf }
 0x58b   :  { %1140 = vmax.xlane.f32.xlu1 %v1139_v51 }
 0x614   :  { %v1138_v52 = vpop.xlane.xlu0 %1137 }
 0x615   :  { %v1142_v53 = vsub.f32 %v1056_v46, %v1138_v52 }
 0x617   :  { %v1144_v54 = vmul.f32 1.442695, %v1142_v53 }
 0x618   :  { %v1141_v55 = vpop.xlane.xlu1 %1140 }
 0x619   :  { %3472 = vpow2.f32 %v1144_v54  ;;  %v1143_v56 = vsub.f32 %v1132_v49, %v1141_v55 }
 0x61b   :  { %v1146_v57 = vmul.f32 1.442695, %v1143_v56 }
 0x61d   :  { %3474 = vpow2.f32 %v1146_v57 }
 0x623   :  { %v3473_v58 = vpop.eup %3472 }
 0x624   :  { %v1148_v59 = vsel %vm394_vm3, %v3473_v58, 0.0 }
 0x625   :  { %1149 = vadd.xlane.f32.xlu0 %v1148_v59 }
 0x627   :  { %v3475_v60 = vpop.eup %3474 }
 0x628   :  { %v1151_v61 = vsel %vm394_vm3, %v3475_v60, 0.0 }
 0x629   :  { %1152 = vadd.xlane.f32.xlu1 %v1151_v61 }
 0x6b2   :  { %v1150_v1 = vpop.xlane.xlu0 %1149 }
 0x6b3   :  { %3476 = vrcp.f32 %v1150_v1 }
 0x6b6   :  { %v1153_v2 = vpop.xlane.xlu1 %1152 }
 0x6b7   :  { %3478 = vrcp.f32 %v1153_v2  ;;  %v2959_v2 = vld [vmem:[%s4014_s3 + $0x60] sm:$0xff] }
 0x6bd   :  { %v3477_v3 = vpop.eup %3476 }
 0x6be   :  { %v3788_v4 = vmul.f32 %v3477_v3, %v3473_v58  ;;  %v2960_v3 = vld [vmem:[%s4014_s3 + $0x68] sm:$0xff] }
 0x6bf   :  { %v3428_v5 = vpack.c.bf16 %v2960_v3, %v2959_v2 }
 0x6c0   :  { %3219 = vmatmul.mubr.msk.f32.vlgmr.msra.gmra.mrb[10].mxu1 %vm394_vm3, %v3788_v4 }
 0x6c1   :  { %v3479_v7 = vpop.eup %3478  ;;  %3227 = vmatpush3.msra.mxu1 %v2921_v18  ;;  %v3432_v18 = vpack.c.bf16 %v2962_v12, %v2961_v11 }
 0x6c2   :  { %v3798_v8 = vmul.f32 %v3479_v7, %v3475_v60  ;;  %3231 = vmatprep.subr.mxu1 %v717_v19 }
 0x6c4   :  { %3224 = vmatmul.mubr.msk.f32.vlgmr.msra.gmra.mrb[16].mxu0 %vm394_vm3, %v3798_v8  ;;  %v1159_v16 = vadd.f32 %v3798_v8, %v3711_v9  ;;  %v2978_v8 = vld [vmem:[%s4014_s3 + $0x178] sm:$0xff] }
 0x6c5   :  { %3407 = vmatpush3.bf16.msra.mxu0 %v3404_v0  ;;  %3244 = vmatprep.mubr.msk.f32.mxu0 %vm134_vm1, %v3648_v25 }
 0x6c6   :  { %3409 = vmatprep.subr.bf16.mxu0 %v3408_v10 }
 0x6c9   :  { %3411 = vmatpush3.bf16.msra.mxu0 %v3408_v10 }
 0x6ca   :  { %3421 = vmatprep.subr.bf16.mxu0 %v3420_v13 }
 0x6cc   :  { %3245 = vmatmul.mubr.msk.f32.vlgmr.msra.gmra.mrb[18].mxu0 %vm134_vm1, %v3650_v26 }
 0x6cd   :  { %3423 = vmatpush3.bf16.msra.mxu0 %v3420_v13  ;;  %3266 = vmatprep.mubr.msk.f32.mxu0 %vm134_vm1, %v3648_v25 }
 0x6ce   :  { %3425 = vmatprep.subr.bf16.mxu0 %v3424_v17 }
 0x6d1   :  { %3427 = vmatpush3.bf16.msra.mxu0 %v3424_v17 }
 0x6d2   :  { %3274 = vmatprep.subr.mxu0 %v3544_v28 }
 0x6d4   :  { %3267 = vmatmul.mubr.msk.f32.vlgmr.msra.gmra.mrb[20].mxu0 %vm134_vm1, %v3650_v26 }
 0x6d5   :  { %3276 = vmatprep.mubr.msk.f32.mxu0 %vm3545_vm2, %v3544_v28 }
 0x793   :  { %v1229_v20 = vpop.f32.mrb[10].mxu1 }
 0x794   :  { %v3220_v27 = vpop.f32.mrb[11].mxu1  ;;  %3228 = vmatprep.mubr.msk.f32.mxu1 %vm394_vm3, %v1229_v20 }
 0x797   :  { %v1302_v30 = vpop.f32.mrb[16].mxu0 }
 0x798   :  { %v3225_v31 = vpop.f32.mrb[17].mxu0  ;;  %3229 = vmatmul.mubr.msk.f32.vlgmr.msra.gmra.mrb[12].mxu1 %vm394_vm3, %v1302_v30  ;;  %v2967_v30 = vld [vmem:[%s4014_s3 + $0xe0] sm:$0xff] }
 0x799   :  { %3232 = vmatpush3.msra.mxu1 %v717_v19  ;;  %3233 = vmatprep.mubr.msk.f32.mxu1 %vm394_vm3, %v3757_v24  ;;  %v1158_v19 = vadd.f32 %v3788_v4, %v3723_v14  ;;  %v3444_v14 = vpack.c.bf16 %v2976_v23, %v2975_v21  ;;  %v2977_v4 = vld [vmem:[%s4014_s3 + $0x170] sm:$0xff]  ;;  %v2968_v31 = vld [vmem:[%s4014_s3 + $0xe8] sm:$0xff] }
 0x79a   :  { %3413 = vmatprep.subr.bf16.mxu1 %v3412_v29  ;;  %v3436_v32 = vpack.c.bf16 %v2968_v31, %v2967_v30 }
 0x79f   :  { %v3246_v35 = vpop.f32.mrb[18].mxu0 }
 0x7a0   :  { %v1549_v36 = vpop.f32.mrb[19].mxu0  ;;  %3234 = vmatmul.mubr.msk.f32.vlgmr.msra.gmra.mrb[12].mxu1 %vm394_vm3, %v3755_v22  ;;  %v2931_v22 = vld [vmem:[%s4015_s4 + $0x2] ss:$0 sm:$0xff] }
 0x7a1   :  { %3415 = vmatpush3.bf16.msra.mxu1 %v3412_v29  ;;  %3255 = vmatprep.mubr.msk.f32.mxu1 %vm134_vm1, %v3648_v25  ;;  %v1555_v39 = vadd.f32 %v3246_v35, %v2931_v22  ;;  %v1550_v41 = vadd.f32 %v2931_v22, %v1549_v36  ;;  %v3448_v29 = vpack.c.bf16 %v2978_v8, %v2977_v4 }
 0x7a2   :  { %3417 = vmatprep.subr.bf16.mxu1 %v3416_v34 }
 0x7a3   :  { %v1735_v46 = vmul.f32 0.35355338, %v1555_v39  ;;  %v1734_v47 = vmul.f32 0.35355338, %v1550_v41 }
 0x7a5   :  { %3419 = vmatpush3.bf16.msra.mxu1 %v3416_v34  ;;  %v2970_v34 = vld [vmem:[%s4014_s3 + $0xf8] sm:$0xff] }
 0x7a6   :  { %3269 = vmatprep.subr.mxu1 %v3544_v28 }
 0x7a7   :  { %v3268_v24 = vpop.f32.mrb[20].mxu0 }
 0x7a8   :  { %3256 = vmatmul.mubr.msk.f32.vlgmr.msra.gmra.mrb[14].mxu1 %vm134_vm1, %v3650_v26  ;;  %v1725_v37 = vpop.f32.mrb[21].mxu0  ;;  %v1731_v48 = vadd.f32 %v3268_v24, %v2947_v44 }
 0x7a9   :  { %3271 = vmatprep.mubr.msk.f32.mxu1 %vm3545_vm2, %v3544_v28  ;;  %v1726_v49 = vadd.f32 %v2947_v44, %v1725_v37  ;;  %v3440_v37 = vpack.c.bf16 %v2970_v34, %v2969_v33  ;;  %v2964_v44 = vld [vmem:[%s4015_s4 + $0x3] ss:$0 sm:$0xff] }
 0x87b   :  { %v3257_v40 = vpop.f32.mrb[14].mxu1 }
 0x87c   :  { %v1643_v42 = vadd.f32 %v3257_v40, %v2939_v38  ;;  %v1637_v43 = vpop.f32.mrb[15].mxu1  ;;  %v2980_v40 = vld [vmem:[%s4015_s4 + $0xb] ss:$0 sm:$0xff] }
 0x87d   :  { %v1638_v45 = vadd.f32 %v2939_v38, %v1637_v43 }
 0x87e   :  { %3275 = vmatpush3.xpose.msk.msra.mxu0 %vm394_vm3, %v1643_v42 }
 0x87f   :  { %3270 = vmatpush3.xpose.msk.msra.mxu1 %vm394_vm3, %v1638_v45  ;;  %3284 = vmatprep.subr.mxu0 %v3544_v28 }
 0x880   :  { %3279 = vmatprep.subr.mxu1 %v3544_v28 }
 0x881   :  { %3277 = vmatmul.mubr.msk.f32.vlgmr.msra.gmra.mrb[22].mxu0 %vm394_vm3, %v1735_v46 }
 0x882   :  { %3272 = vmatmul.mubr.msk.f32.vlgmr.msra.gmra.mrb[16].mxu1 %vm394_vm3, %v1734_v47  ;;  %3285 = vmatpush3.msra.mxu0 %v1731_v48 }
 0x883   :  { %3280 = vmatpush3.msra.mxu1 %v1726_v49  ;;  %3286 = vmatprep.mubr.msk.f32.mxu0 %vm3545_vm2, %v3544_v28 }
 0x884   :  { %3281 = vmatprep.mubr.msk.f32.mxu1 %vm3545_vm2, %v3544_v28  ;;  %3429 = vmatprep.subr.bf16.mxu0 %v3428_v5 }
 0x885   :  { %3289 = vmatprep.subr.mxu1 %v2956_v6 }
 0x954   :  { %v1884_v50 = vpop.f32.mrb[22].mxu0 }
 0x955   :  { %v1808_v51 = vpop.f32.mrb[16].mxu1  ;;  %v3278_v52 = vpop.f32.mrb[23].mxu0  ;;  %v1891_v53 = vsel %vm394_vm3, %v1884_v50, -inf }
 0x956   :  { %1892 = vmax.xlane.f32.xlu1 %v1891_v53  ;;  %v3273_v54 = vpop.f32.mrb[17].mxu1  ;;  %v1888_v55 = vsel %vm394_vm3, %v1808_v51, -inf }
 0x957   :  { %1889 = vmax.xlane.f32.xlu0 %v1888_v55 }
 0x9e3   :  { %v1893_v56 = vpop.xlane.xlu1 %1892 }
 0x9e4   :  { %v1895_v57 = vsub.f32 %v1884_v50, %v1893_v56  ;;  %v1890_v58 = vpop.xlane.xlu0 %1889 }
 0x9e5   :  { %v1894_v59 = vsub.f32 %v1808_v51, %v1890_v58 }
 0x9e6   :  { %v1898_v60 = vmul.f32 1.442695, %v1895_v57 }
 0x9e7   :  { %v1896_v61 = vmul.f32 1.442695, %v1894_v59 }
 0x9e8   :  { %3480 = vpow2.f32 %v1898_v60 }
 0x9e9   :  { %3482 = vpow2.f32 %v1896_v61 }
 0x9f2   :  { %v3481_v62 = vpop.eup %3480 }
 0x9f3   :  { %v3483_v63 = vpop.eup %3482  ;;  %v1903_v0 = vsel %vm394_vm3, %v3481_v62, 0.0 }
 0x9f4   :  { %1904 = vadd.xlane.f32.xlu1 %v1903_v0  ;;  %v1900_v1 = vsel %vm394_vm3, %v3483_v63, 0.0 }
 0x9f5   :  { %1901 = vadd.xlane.f32.xlu0 %v1900_v1 }
 0xa81   :  { %v1905_v7 = vpop.xlane.xlu1 %1904 }
 0xa82   :  { %3484 = vrcp.f32 %v1905_v7  ;;  %v1902_v10 = vpop.xlane.xlu0 %1901 }
 0xa83   :  { %3486 = vrcp.f32 %v1902_v10 }
 0xa8c   :  { %v3485_v13 = vpop.eup %3484 }
 0xa8d   :  { %v3487_v15 = vpop.eup %3486  ;;  %v1909_v17 = vmul.f32 %v3485_v13, %v3481_v62 }
 0xa8e   :  { %v1908_v20 = vmul.f32 %v3487_v15, %v3483_v63 }
 0xa8f   :  { %3287 = vmatmul.mubr.msk.f32.vlgmr.msra.gmra.mrb[24].mxu0 %vm394_vm3, %v1909_v17  ;;  %v3905_v27 = vadd.f32 %v1909_v17, %v1159_v16 }
 0xa90   :  { %3431 = vmatpush3.bf16.msra.mxu0 %v3428_v5  ;;  %3282 = vmatmul.mubr.msk.f32.vlgmr.msra.gmra.mrb[18].mxu1 %vm394_vm3, %v1908_v20  ;;  %v3908_v9 = vadd.f32 %v1908_v20, %v1158_v19 }
 0xa91   :  { %3302 = vmatprep.mubr.msk.f32.mxu0 %vm134_vm1, %v3648_v25  ;;  %3433 = vmatprep.subr.bf16.mxu0 %v3432_v18 }
 0xa92   :  { %3290 = vmatpush3.msra.mxu1 %v2956_v6 }
 0xa93   :  { %3437 = vmatprep.subr.bf16.mxu1 %v3436_v32 }
 0xa94   :  { %3435 = vmatpush3.bf16.msra.mxu0 %v3432_v18  ;;  %v2989_v18 = vld [vmem:[%s4016_s5 + $0x18] sm:$0xff] }
 0xa95   :  { %3445 = vmatprep.subr.bf16.mxu0 %v3444_v14 }
 0xa97   :  { %3303 = vmatmul.mubr.msk.f32.vlgmr.msra.gmra.mrb[26].mxu0 %vm134_vm1, %v3650_v26 }
 0xa98   :  { %3447 = vmatpush3.bf16.msra.mxu0 %v3444_v14  ;;  %3324 = vmatprep.mubr.msk.f32.mxu0 %vm134_vm1, %v3648_v25 }
 0xa99   :  { %3449 = vmatprep.subr.bf16.mxu0 %v3448_v29 }
 0xa9c   :  { %3451 = vmatpush3.bf16.msra.mxu0 %v3448_v29 }
 0xa9d   :  { %3337 = vmatprep.subr.mxu0 %v3544_v28 }
 0xa9f   :  { %3325 = vmatmul.mubr.msk.f32.vlgmr.msra.gmra.mrb[28].mxu0 %vm134_vm1, %v3650_v26 }
 0xaa0   :  { %3339 = vmatprep.mubr.msk.f32.mxu0 %vm3545_vm2, %v3544_v28 }
 0xb62   :  { %v2054_v35 = vpop.f32.mrb[24].mxu0 }
 0xb63   :  { %v1981_v36 = vpop.f32.mrb[18].mxu1  ;;  %v3288_v24 = vpop.f32.mrb[25].mxu0 }
 0xb64   :  { %v3283_v22 = vpop.f32.mrb[19].mxu1  ;;  %3291 = vmatprep.mubr.msk.f32.mxu1 %vm394_vm3, %v1981_v36 }
 0xb65   :  { %3292 = vmatmul.mubr.msk.f32.vlgmr.msra.gmra.mrb[12].mxu1 %vm394_vm3, %v2054_v35 }
 0xb66   :  { %3439 = vmatpush3.bf16.msra.mxu1 %v3436_v32  ;;  %3313 = vmatprep.mubr.msk.f32.mxu1 %vm134_vm1, %v3648_v25 }
 0xb67   :  { %3441 = vmatprep.subr.bf16.mxu1 %v3440_v37 }
 0xb6a   :  { %v3304_v38 = vpop.f32.mrb[26].mxu0  ;;  %3443 = vmatpush3.bf16.msra.mxu1 %v3440_v37 }
 0xb6b   :  { %v2222_v39 = vpop.f32.mrb[27].mxu0  ;;  %3327 = vmatprep.subr.mxu1 %v3544_v28  ;;  %v2228_v49 = vadd.f32 %v3304_v38, %v2964_v44 }
 0xb6c   :  { %v2223_v46 = vadd.f32 %v2964_v44, %v2222_v39 }
 0xb6d   :  { %3314 = vmatmul.mubr.msk.f32.vlgmr.msra.gmra.mrb[20].mxu1 %vm134_vm1, %v3650_v26  ;;  %v2972_v26 = vld [vmem:[%s4015_s4 + $0x7] ss:$0 sm:$0xff]  ;;  %v2408_v52 = vmul.f32 0.35355338, %v2228_v49 }
 0xb6e   :  { %3329 = vmatprep.mubr.msk.f32.mxu1 %vm3545_vm2, %v3544_v28  ;;  %v2407_v50 = vmul.f32 0.35355338, %v2223_v46 }
 0xb72   :  { %v3326_v41 = vpop.f32.mrb[28].mxu0 }
 0xb73   :  { %v2404_v42 = vadd.f32 %v3326_v41, %v2980_v40  ;;  %v2398_v43 = vpop.f32.mrb[29].mxu0 }
 0xb74   :  { %v2399_v25 = vadd.f32 %v2980_v40, %v2398_v43 }
 0xb76   :  { %3338 = vmatpush3.msra.mxu0 %v2399_v25 }
 0xc40   :  { %v3315_v45 = vpop.f32.mrb[20].mxu1 }
 0xc41   :  { %v2310_v47 = vpop.f32.mrb[21].mxu1  ;;  %v2316_v51 = vadd.f32 %v3315_v45, %v2972_v26 }
 0xc42   :  { %v2311_v48 = vadd.f32 %v2972_v26, %v2310_v47 }
 0xc44   :  { %3328 = vmatpush3.xpose.msk.msra.mxu1 %vm394_vm3, %v2311_v48 }
 0xc45   :  { %3332 = vmatprep.subr.mxu1 %v3544_v28 }
 0xc47   :  { %3330 = vmatmul.mubr.msk.f32.vlgmr.msra.gmra.mrb[22].mxu1 %vm394_vm3, %v2407_v50 }
 0xc48   :  { %3333 = vmatpush3.xpose.msk.msra.mxu1 %vm394_vm3, %v2316_v51  ;;  %3334 = vmatprep.mubr.msk.f32.mxu1 %vm3545_vm2, %v3544_v28 }
 0xc49   :  { %3342 = vmatprep.subr.mxu1 %v3544_v28 }
 0xc4b   :  { %3335 = vmatmul.mubr.msk.f32.vlgmr.msra.gmra.mrb[24].mxu1 %vm394_vm3, %v2408_v52 }
 0xc4c   :  { %3343 = vmatpush3.msra.mxu1 %v2404_v42  ;;  %3344 = vmatprep.mubr.msk.f32.mxu1 %vm3545_vm2, %v3544_v28 }
 0xc4d   :  { %3347 = vmatprep.subr.mxu1 %v2989_v18 }
 0xd1a   :  { %v2481_v53 = vpop.f32.mrb[22].mxu1 }
 0xd1b   :  { %v3331_v54 = vpop.f32.mrb[23].mxu1  ;;  %v2561_v55 = vsel %vm394_vm3, %v2481_v53, -inf }
 0xd1c   :  { %2562 = vmax.xlane.f32.xlu0 %v2561_v55 }
 0xd1e   :  { %v2557_v56 = vpop.f32.mrb[24].mxu1 }
 0xd1f   :  { %v3336_v57 = vpop.f32.mrb[25].mxu1  ;;  %v2564_v58 = vsel %vm394_vm3, %v2557_v56, -inf }
 0xd20   :  { %2565 = vmax.xlane.f32.xlu1 %v2564_v58 }
 0xda9   :  { %v2563_v59 = vpop.xlane.xlu0 %2562 }
 0xdaa   :  { %v2567_v60 = vsub.f32 %v2481_v53, %v2563_v59 }
 0xdac   :  { %v2569_v61 = vmul.f32 1.442695, %v2567_v60 }
 0xdad   :  { %v2566_v62 = vpop.xlane.xlu1 %2565 }
 0xdae   :  { %3488 = vpow2.f32 %v2569_v61  ;;  %v2568_v63 = vsub.f32 %v2557_v56, %v2566_v62 }
 0xdb0   :  { %v2571_v0 = vmul.f32 1.442695, %v2568_v63 }
 0xdb2   :  { %3490 = vpow2.f32 %v2571_v0 }
 0xdb8   :  { %v3489_v1 = vpop.eup %3488 }
 0xdb9   :  { %v2573_v28 = vsel %vm394_vm3, %v3489_v1, 0.0 }
 0xdba   :  { %2574 = vadd.xlane.f32.xlu0 %v2573_v28 }
 0xdbc   :  { %v3491_v2 = vpop.eup %3490 }
 0xdbd   :  { %v2576_v3 = vsel %vm394_vm3, %v3491_v2, 0.0 }
 0xdbe   :  { %2577 = vadd.xlane.f32.xlu1 %v2576_v3 }
 0xe47   :  { %v2575_v5 = vpop.xlane.xlu0 %2574 }
 0xe48   :  { %3492 = vrcp.f32 %v2575_v5 }
 0xe4b   :  { %v2578_v6 = vpop.xlane.xlu1 %2577 }
 0xe4c   :  { %3494 = vrcp.f32 %v2578_v6 }
 0xe52   :  { %v3493_v7 = vpop.eup %3492 }
 0xe53   :  { %v2581_v10 = vmul.f32 %v3493_v7, %v3489_v1 }
 0xe55   :  { %3340 = vmatmul.mubr.msk.f32.vlgmr.msra.gmra.mrb[30].mxu0 %vm394_vm3, %v2581_v10  ;;  %v2583_v11 = vadd.f32 %v2581_v10, %v3908_v9 }
 0xe56   :  { %v3495_v12 = vpop.eup %3494 }
 0xe57   :  { %v2582_v13 = vmul.f32 %v3495_v12, %v3491_v2  ;;  %v2827_v15 = vmul.f32 0.25, %v2583_v11 }
 0xe59   :  { %3345 = vmatmul.mubr.msk.f32.vlgmr.msra.gmra.mrb[26].mxu1 %vm394_vm3, %v2582_v13  ;;  %v2584_v16 = vadd.f32 %v2582_v13, %v3905_v27  ;;  %2829 = vst.msk [vmem:[#allocation4] sm:$0xff] %vm394_vm3, %v2827_v15 }
 0xe5a   :  { %3348 = vmatpush3.msra.mxu1 %v2989_v18 }
 0xe5b   :  { %v2828_v17 = vmul.f32 0.25, %v2584_v16 }
 0xe5d   :  { %2830 = vst.msk [vmem:[#allocation4 + $0x8] sm:$0xff] %vm394_vm3, %v2828_v17 }
 0xf28   :  { %v2654_v19 = vpop.f32.mrb[30].mxu0 }
 0xf29   :  { %v3341_v20 = vpop.f32.mrb[31].mxu0  ;;  %3349 = vmatprep.mubr.msk.f32.mxu1 %vm394_vm3, %v2654_v19 }
 0xf2c   :  { %v2727_v21 = vpop.f32.mrb[26].mxu1 }
 0xf2d   :  { %v3346_v23 = vpop.f32.mrb[27].mxu1  ;;  %3350 = vmatmul.mubr.msk.f32.vlgmr.msra.gmra.mrb[12].mxu1 %vm394_vm3, %v2727_v21 }
 0xf2e   :  { %3507 = shalt.err (!%p3504_p4)
}
 0xf2f   :  { %s3508_s19 = scalar_lea.hbm %s4019_s8, 256 }
 0xf30   :  { %p3509_p5 = scmp.ne.s32.totalorder %s4019_s8, %s3508_s19  ;;  %p3512_p6 = scmp.lt.u32.totalorder %s3508_s19, %s4019_s8 }
 0xf32   :  { %p3514_p7 = pnand %p3512_p6, %p3509_p5 }
 0xf34   :  { %3517 = shalt.err (!%p3514_p7)
}
 0xf35   :  { %s3547_s24 = smov 128   ;;  %s3548_s25 = smov 8   ;;  %v2992_v27 = vld [vmem:[%s4017_s6] ss:$0 sm:$0xff] }
 0xf36   :  { %2854 = dma.vmem_to_hbm [thread:$0]  %s2849_s1, 256, %s4019_s8, [#allocation5], %s3547_s24, %s3547_s24, %s3548_s25  }
 0xf37   :  { %s3549_s29 = smov [#allocation2]  }
 0xf38   :  { %s2836_s30 = sshll.u32 %s3549_s29, 4  ;;  %s2837_s30 = int_to_ptr.vmem [resolvable:$true] %s2836_s30 }
 0xf39   :  { %s3518_s9 = scalar_lea.vmem %s2837_s30, 256  ;;  %p3523_p9 = scmp.lt.s32.totalorder %s2837_s30, %s2837_s30 }
 0xf3a   :  { %p3519_p8 = scmp.ne.s32.totalorder %s2837_s30, %s3518_s9  ;;  %p3524_p10 = scmp.lt.s32.totalorder %s3518_s9, %s3518_s9 }
 0xf3c   :  { %p3525_p11 = por %p3524_p10, %p3523_p9 }
 0xf3e   :  { %p3526_p12 = pnand %p3525_p11, %p3519_p8 }
0x1000   :  { %v3351_v9 = vpop.f32.mrb[12].mxu1 }
0x1001   :  { %v2824_v14 = vadd.f32 %v3351_v9, %v2992_v27  ;;  %v2805_v4 = vpop.f32.mrb[13].mxu1 }
0x1002   :  { %v2823_v8 = vadd.f32 %v2992_v27, %v2805_v4 }
0x1003   :  { %2826 = vst.msk [vmem:[#allocation2 + $0x8] sm:$0xff] %vm134_vm1, %v2824_v14 }
0x1004   :  { %2825 = vst.msk [vmem:[#allocation2] sm:$0xff] %vm134_vm1, %v2823_v8 }
0x1005   :  { %3529 = shalt.err (!%p3526_p12)
}
0x1006   :  { %s3530_s10 = scalar_lea.hbm %s4018_s7, 256 }
0x1007   :  { %p3531_p13 = scmp.ne.s32.totalorder %s4018_s7, %s3530_s10  ;;  %p3534_p0 = scmp.lt.u32.totalorder %s3530_s10, %s4018_s7 }
0x1009   :  { %p3536_p1 = pnand %p3534_p0, %p3531_p13 }
0x100b   :  { %3539 = shalt.err (!%p3536_p1)
}
0x100c   :  { %2842 = dma.vmem_to_hbm [thread:$0]  %s2837_s30, 256, %s4018_s7, [#allocation3], %s3547_s24, %s3547_s24, %s3548_s25  }
0x100d   :  { %3540 = dma.done.wait [#allocation3], 256  }
0x100e   :  { %3541 = vsyncadd [#allocation3], 4294967040 }
0x100f   :  { %3542 = dma.done.wait [#allocation5], 256  }
0x1010   :  { %3543 = vsyncadd [#allocation5], 4294967040 }
0x1011   :  { %2861 = vsyncpa [#allocation3], 1 }
0x1012   :  { %2862 = vsyncpa [#allocation5], 1 }

</bundles_post_ra>
